<compile_context>
chip_gen: v5e
topology: v5e:2x2
jax: 0.10.0
libtpu: 0.0.40
codegen_flags: <defaults>
</compile_context>

<pallas_src>
import functools

import jax
import jax.numpy as jnp
from jax.experimental import pallas as pl
from jax.experimental.pallas import tpu as pltpu

D_MODEL = 32      # config['balance_model_config']['feature_dim']
N_HEAD = 4
D_FF = 64
N_LAYERS = 2
EPS = 1e-5


def _layernorm(x, gamma, beta):
    mu = jnp.mean(x, axis=-1, keepdims=True)
    var = jnp.mean((x - mu) ** 2, axis=-1, keepdims=True)
    return (x - mu) * jax.lax.rsqrt(var + EPS) * gamma + beta


# ---------------------------------------------------------------------------
# Fused kernel: 2 encoder layers + mean pool + fc, single grid step.
# ---------------------------------------------------------------------------
def fused_kernel(x_ref, wa_ref, w2_ref, vec_ref, fcw_ref, fcb_ref, out_ref,
                 *, B, S, n_layers):
    D = x_ref.shape[-1]
    hd = D // N_HEAD
    BS = B * S

    x2 = x_ref[...]                                          # (BS, D)

    for l in range(n_layers):                                # static unroll
        wa = wa_ref[l]                                       # (D, 3D + D + D_FF)
        w_qkv = wa[:, 0:3 * D]                               # (D, 3D), scale folded
        w_o   = wa[:, 3 * D:4 * D]                           # (D, D)
        w_1   = wa[:, 4 * D:4 * D + D_FF]                    # (D, D_FF)
        w_2   = w2_ref[l]                                    # (D_FF, D)
        vec   = vec_ref[l]                                   # (8, 3D)
        b_qkv = vec[0:1, 0:3 * D]
        b_o   = vec[1:2, 0:D]
        g1    = vec[2:3, 0:D]
        be1   = vec[3:4, 0:D]
        b_1   = vec[4:5, 0:D_FF]
        b_2   = vec[5:6, 0:D]
        g2    = vec[6:7, 0:D]
        be2   = vec[7:8, 0:D]

        # fused in_proj: one (BS, D) @ (D, 3D) matmul
        qkv = jnp.dot(x2, w_qkv, preferred_element_type=jnp.float32) + b_qkv
        q2 = qkv[:, 0:D]
        k2 = qkv[:, D:2 * D]
        v2 = qkv[:, 2 * D:3 * D]

        # multi-head self-attention (src_mask=None). Per head: batch-leading
        # 3-D einsums; output accumulated through the matching Wo row-block
        # (avoids a lane-dim concatenate of head outputs).
        attn = jnp.zeros((BS, D), dtype=jnp.float32)
        for h in range(N_HEAD):
            sl = slice(h * hd, (h + 1) * hd)
            qh = q2[:, sl].reshape(B, S, hd)
            kh = k2[:, sl].reshape(B, S, hd)
            vh = v2[:, sl].reshape(B, S, hd)
            s = jnp.einsum('bqd,bkd->bqk', qh, kh,
                           preferred_element_type=jnp.float32)
            s = s - jnp.max(s, axis=-1, keepdims=True)
            p = jnp.exp(s)
            p = p * pl.reciprocal(jnp.sum(p, axis=-1, keepdims=True), approx=True)
            oh = jnp.einsum('bqk,bkd->bqd', p, vh,
                            preferred_element_type=jnp.float32)
            attn = attn + jnp.dot(oh.reshape(BS, hd), w_o[sl, :],
                                  preferred_element_type=jnp.float32)

        # residual + post-norm (norm_first=False); dropout = identity (eval)
        y = _layernorm(x2 + attn + b_o, g1, be1)

        # feed-forward: linear1 -> relu -> linear2, residual, norm2
        h1 = jnp.maximum(
            jnp.dot(y, w_1, preferred_element_type=jnp.float32) + b_1, 0.0)
        h2 = jnp.dot(h1, w_2, preferred_element_type=jnp.float32) + b_2
        x2 = _layernorm(y + h2, g2, be2)

    # mean pool over sequence + final fc (d_model -> 1), all in-kernel
    pooled = jnp.mean(x2.reshape(B, S, D), axis=1)           # (B, D)
    out = jnp.sum(pooled * fcw_ref[...], axis=-1, keepdims=True) + fcb_ref[...]
    out_ref[...] = out


def transformer_valuenet_forward(x, packed):
    wa, w2, vec, fcw, fcb = packed
    B, S, D = x.shape
    x2 = x.reshape(B * S, D)
    kernel = functools.partial(fused_kernel, B=B, S=S, n_layers=N_LAYERS)
    return pl.pallas_call(
        kernel,
        out_shape=jax.ShapeDtypeStruct((B, 1), jnp.float32),
        grid=(1,),
        in_specs=[
            pl.BlockSpec((B * S, D), lambda i: (0, 0)),
            pl.BlockSpec(wa.shape, lambda i: (0, 0, 0)),
            pl.BlockSpec(w2.shape, lambda i: (0, 0, 0)),
            pl.BlockSpec(vec.shape, lambda i: (0, 0, 0)),
            pl.BlockSpec(fcw.shape, lambda i: (0, 0)),
            pl.BlockSpec(fcb.shape, lambda i: (0, 0)),
        ],
        out_specs=pl.BlockSpec((B, 1), lambda i: (0, 0)),
        compiler_params=pltpu.CompilerParams(
            dimension_semantics=("arbitrary",)),
    )(x2, wa, w2, vec, fcw, fcb)


# ---------------------------------------------------------------------------
# Parameter packing (host side): fold 1/sqrt(hd) into Wq/bq, fuse QKV,
# concatenate per-layer weights/vectors into contiguous slabs.
# ---------------------------------------------------------------------------
def pack_params(layer_params, fc_w, fc_b):
    hd = D_MODEL // N_HEAD
    scale = 1.0 / (hd ** 0.5)
    vw = 3 * D_MODEL  # vector-slab width (widest vector is b_qkv)

    def row(v):
        return jnp.pad(v, ((0, 0), (0, vw - v.shape[1])))

    wa_list, w2_list, vec_list = [], [], []
    for p in layer_params:
        w_qkv = jnp.concatenate([p['wq'] * scale, p['wk'], p['wv']], axis=1)
        wa_list.append(jnp.concatenate([w_qkv, p['wo'], p['w1']], axis=1))
        w2_list.append(p['w2'])
        b_qkv = jnp.concatenate([p['bq'] * scale, p['bk'], p['bv']], axis=1)
        vec_list.append(jnp.concatenate([
            row(b_qkv), row(p['bo']), row(p['g1']), row(p['be1']),
            row(p['b1']), row(p['b2']), row(p['g2']), row(p['be2'])], axis=0))
    wa = jnp.stack(wa_list).astype(jnp.float32)    # (L, D, 3D + D + D_FF)
    w2 = jnp.stack(w2_list).astype(jnp.float32)    # (L, D_FF, D)
    vec = jnp.stack(vec_list).astype(jnp.float32)  # (L, 8, 3D)
    fcw = fc_w.T.astype(jnp.float32)               # (1, D)
    fcb = fc_b.astype(jnp.float32)                 # (1, 1)
    return wa, w2, vec, fcw, fcb


# ---------------------------------------------------------------------------
# Deterministic parameter init + pure-JAX reference for sanity checking
# ---------------------------------------------------------------------------
def init_params(key):
    layer_params = []
    for _ in range(N_LAYERS):
        ks = jax.random.split(key, 17)
        key = ks[0]
        n = lambda k, shape, s=0.1: (s * jax.random.normal(k, shape)).astype(jnp.float32)
        layer_params.append(dict(
            wq=n(ks[1], (D_MODEL, D_MODEL)), wk=n(ks[2], (D_MODEL, D_MODEL)),
            wv=n(ks[3], (D_MODEL, D_MODEL)),
            bq=n(ks[4], (1, D_MODEL)), bk=n(ks[5], (1, D_MODEL)), bv=n(ks[6], (1, D_MODEL)),
            wo=n(ks[7], (D_MODEL, D_MODEL)), bo=n(ks[8], (1, D_MODEL)),
            g1=(1.0 + n(ks[9], (1, D_MODEL))), be1=n(ks[10], (1, D_MODEL)),
            w1=n(ks[11], (D_MODEL, D_FF)), b1=n(ks[12], (1, D_FF)),
            w2=n(ks[13], (D_FF, D_MODEL)), b2=n(ks[14], (1, D_MODEL)),
            g2=(1.0 + n(ks[15], (1, D_MODEL))), be2=n(ks[16], (1, D_MODEL)),
        ))
    k1, k2 = jax.random.split(key)
    fc_w = (0.1 * jax.random.normal(k1, (D_MODEL, 1))).astype(jnp.float32)
    fc_b = (0.1 * jax.random.normal(k2, (1, 1))).astype(jnp.float32)
    return layer_params, fc_w, fc_b


def ref_layer(x, p):
    B, S, D = x.shape
    hd = D // N_HEAD
    q = x @ p['wq'] + p['bq']
    k = x @ p['wk'] + p['bk']
    v = x @ p['wv'] + p['bv']
    q = q.reshape(B, S, N_HEAD, hd)
    k = k.reshape(B, S, N_HEAD, hd)
    v = v.reshape(B, S, N_HEAD, hd)
    s = jnp.einsum('bqhd,bkhd->bhqk', q, k) / jnp.sqrt(jnp.float32(hd))
    pattn = jax.nn.softmax(s, axis=-1)
    o = jnp.einsum('bhqk,bkhd->bqhd', pattn, v).reshape(B, S, D)
    o = o @ p['wo'] + p['bo']
    y = _layernorm(x + o, p['g1'], p['be1'])
    h = jnp.maximum(y @ p['w1'] + p['b1'], 0.0) @ p['w2'] + p['b2']
    return _layernorm(y + h, p['g2'], p['be2'])


def ref_forward(x, layer_params, fc_w, fc_b):
    y = x
    for p in layer_params:
        y = ref_layer(y, p)
    return jnp.mean(y, axis=1) @ fc_w + fc_b


if __name__ == "__main__":
    key = jax.random.PRNGKey(0)
    kx, kp = jax.random.split(key)
    B, S = 2, 8
    x = jax.random.normal(kx, (B, S, D_MODEL), dtype=jnp.float32)
    layer_params, fc_w, fc_b = init_params(kp)
    packed = pack_params(layer_params, fc_w, fc_b)

    out = transformer_valuenet_forward(x, packed)
    out = jax.block_until_ready(out)

    ref = jax.block_until_ready(ref_forward(x, layer_params, fc_w, fc_b))
    assert out.shape == (B, 1)
    assert bool(jnp.all(jnp.isfinite(out)))
    assert bool(jnp.allclose(out, ref, rtol=5e-2, atol=5e-3)), (out, ref)
    print("KERNEL_OK")
</pallas_src>

<mosaic_0001>
module attributes {stable_mosaic.version = 11 : i64} {
  func.func @fused_kernel(%arg0: i32, %arg1: memref<16x32xf32, #tpu.memory_space<vmem>>, %arg2: memref<2x32x192xf32, #tpu.memory_space<vmem>>, %arg3: memref<2x64x32xf32, #tpu.memory_space<vmem>>, %arg4: memref<2x8x96xf32, #tpu.memory_space<vmem>>, %arg5: memref<1x32xf32, #tpu.memory_space<vmem>>, %arg6: memref<1x1xf32, #tpu.memory_space<vmem>>, %arg7: memref<2x1xf32, #tpu.memory_space<vmem>>) attributes {dimension_semantics = [#tpu.dimension_semantics<arbitrary>], iteration_bounds = array<i64: 1>, scalar_prefetch = 0 : i64, scratch_operands = 0 : i64, tpu.core_type = #tpu.core_type<tc>, window_params = [{pipeline_mode = #tpu.pipeline_mode<synchronous>, transform_indices = @transform_0, window_bounds = array<i64: 16, 32>}, {pipeline_mode = #tpu.pipeline_mode<synchronous>, transform_indices = @transform_1, window_bounds = array<i64: 2, 32, 192>}, {pipeline_mode = #tpu.pipeline_mode<synchronous>, transform_indices = @transform_2, window_bounds = array<i64: 2, 64, 32>}, {pipeline_mode = #tpu.pipeline_mode<synchronous>, transform_indices = @transform_3, window_bounds = array<i64: 2, 8, 96>}, {pipeline_mode = #tpu.pipeline_mode<synchronous>, transform_indices = @transform_4, window_bounds = array<i64: 1, 32>}, {pipeline_mode = #tpu.pipeline_mode<synchronous>, transform_indices = @transform_5, window_bounds = array<i64: 1, 1>}, {pipeline_mode = #tpu.pipeline_mode<synchronous>, transform_indices = @transform_6, window_bounds = array<i64: 2, 1>}]} {
    %c0 = arith.constant 0 : index
    %c0_0 = arith.constant 0 : index
    %0 = vector.load %arg1[%c0, %c0_0] : memref<16x32xf32, #tpu.memory_space<vmem>>, vector<16x32xf32>
    %c0_1 = arith.constant 0 : index
    %c0_2 = arith.constant 0 : index
    %c0_3 = arith.constant 0 : index
    %1 = vector.load %arg2[%c0_1, %c0_2, %c0_3] : memref<2x32x192xf32, #tpu.memory_space<vmem>>, vector<1x32x192xf32>
    %2 = vector.shape_cast %1 : vector<1x32x192xf32> to vector<32x192xf32>
    %3 = vector.extract_strided_slice %2 {offsets = [0, 0], sizes = [32, 96], strides = [1, 1]} : vector<32x192xf32> to vector<32x96xf32>
    %4 = vector.extract_strided_slice %2 {offsets = [0, 96], sizes = [32, 32], strides = [1, 1]} : vector<32x192xf32> to vector<32x32xf32>
    %5 = vector.extract_strided_slice %2 {offsets = [0, 128], sizes = [32, 64], strides = [1, 1]} : vector<32x192xf32> to vector<32x64xf32>
    %c0_4 = arith.constant 0 : index
    %c0_5 = arith.constant 0 : index
    %c0_6 = arith.constant 0 : index
    %6 = vector.load %arg3[%c0_4, %c0_5, %c0_6] : memref<2x64x32xf32, #tpu.memory_space<vmem>>, vector<1x64x32xf32>
    %7 = vector.shape_cast %6 : vector<1x64x32xf32> to vector<64x32xf32>
    %c0_7 = arith.constant 0 : index
    %c0_8 = arith.constant 0 : index
    %c0_9 = arith.constant 0 : index
    %8 = vector.load %arg4[%c0_7, %c0_8, %c0_9] : memref<2x8x96xf32, #tpu.memory_space<vmem>>, vector<1x8x96xf32>
    %9 = vector.shape_cast %8 : vector<1x8x96xf32> to vector<8x96xf32>
    %10 = vector.extract_strided_slice %9 {offsets = [0, 0], sizes = [1, 96], strides = [1, 1]} : vector<8x96xf32> to vector<1x96xf32>
    %11 = vector.extract_strided_slice %9 {offsets = [1, 0], sizes = [1, 32], strides = [1, 1]} : vector<8x96xf32> to vector<1x32xf32>
    %12 = vector.extract_strided_slice %9 {offsets = [2, 0], sizes = [1, 32], strides = [1, 1]} : vector<8x96xf32> to vector<1x32xf32>
    %13 = vector.extract_strided_slice %9 {offsets = [3, 0], sizes = [1, 32], strides = [1, 1]} : vector<8x96xf32> to vector<1x32xf32>
    %14 = vector.extract_strided_slice %9 {offsets = [4, 0], sizes = [1, 64], strides = [1, 1]} : vector<8x96xf32> to vector<1x64xf32>
    %15 = vector.extract_strided_slice %9 {offsets = [5, 0], sizes = [1, 32], strides = [1, 1]} : vector<8x96xf32> to vector<1x32xf32>
    %16 = vector.extract_strided_slice %9 {offsets = [6, 0], sizes = [1, 32], strides = [1, 1]} : vector<8x96xf32> to vector<1x32xf32>
    %17 = vector.extract_strided_slice %9 {offsets = [7, 0], sizes = [1, 32], strides = [1, 1]} : vector<8x96xf32> to vector<1x32xf32>
    %cst = arith.constant dense<0.000000e+00> : vector<16x96xf32>
    %18 = tpu.matmul %0, %3, %cst {dimension_numbers = #tpu.dot_dimension_numbers<[1], [0], [0], [1], [0, 0, 1, 1], [], []>} : vector<16x32xf32>, vector<32x96xf32>, vector<16x96xf32> -> vector<16x96xf32>
    %19 = vector.broadcast %10 : vector<1x96xf32> to vector<16x96xf32>
    %20 = arith.addf %18, %19 : vector<16x96xf32>
    %21 = vector.extract_strided_slice %20 {offsets = [0, 0], sizes = [16, 32], strides = [1, 1]} : vector<16x96xf32> to vector<16x32xf32>
    %22 = vector.extract_strided_slice %20 {offsets = [0, 32], sizes = [16, 32], strides = [1, 1]} : vector<16x96xf32> to vector<16x32xf32>
    %23 = vector.extract_strided_slice %20 {offsets = [0, 64], sizes = [16, 32], strides = [1, 1]} : vector<16x96xf32> to vector<16x32xf32>
    %cst_10 = arith.constant 0.000000e+00 : f32
    %24 = vector.broadcast %cst_10 : f32 to vector<16x32xf32>
    %25 = vector.extract_strided_slice %21 {offsets = [0, 0], sizes = [16, 8], strides = [1, 1]} : vector<16x32xf32> to vector<16x8xf32>
    %26 = vector.shape_cast %25 : vector<16x8xf32> to vector<2x8x8xf32>
    %27 = vector.extract_strided_slice %22 {offsets = [0, 0], sizes = [16, 8], strides = [1, 1]} : vector<16x32xf32> to vector<16x8xf32>
    %28 = vector.shape_cast %27 : vector<16x8xf32> to vector<2x8x8xf32>
    %29 = vector.extract_strided_slice %23 {offsets = [0, 0], sizes = [16, 8], strides = [1, 1]} : vector<16x32xf32> to vector<16x8xf32>
    %30 = vector.shape_cast %29 : vector<16x8xf32> to vector<2x8x8xf32>
    "tpu.trace_start"() <{level = 10 : i32, message = "bqd,bkd->bqk"}> : () -> ()
    %cst_11 = arith.constant dense<0.000000e+00> : vector<2x8x8xf32>
    %31 = tpu.matmul %26, %28, %cst_11 {dimension_numbers = #tpu.dot_dimension_numbers<[2], [2], [1], [1], [0, 0, 0, 1, 1, 1], [0], [0]>} : vector<2x8x8xf32>, vector<2x8x8xf32>, vector<2x8x8xf32> -> vector<2x8x8xf32>
    "tpu.trace_stop"() : () -> ()
    %cst_12 = arith.constant dense<0xFF800000> : vector<2x8xf32>
    %32 = vector.multi_reduction <maximumf>, %31, %cst_12 [2] : vector<2x8x8xf32> to vector<2x8xf32>
    %33 = vector.shape_cast %32 : vector<2x8xf32> to vector<2x8x1xf32>
    %34 = vector.broadcast %33 : vector<2x8x1xf32> to vector<2x8x8xf32>
    %35 = arith.subf %31, %34 : vector<2x8x8xf32>
    %36 = math.exp %35 : vector<2x8x8xf32>
    %cst_13 = arith.constant dense<0.000000e+00> : vector<2x8xf32>
    %37 = vector.multi_reduction <add>, %36, %cst_13 [2] : vector<2x8x8xf32> to vector<2x8xf32>
    %38 = vector.shape_cast %37 : vector<2x8xf32> to vector<2x8x1xf32>
    %39 = tpu.reciprocal %38 {approx = true} : vector<2x8x1xf32> -> vector<2x8x1xf32>
    %40 = vector.broadcast %39 : vector<2x8x1xf32> to vector<2x8x8xf32>
    %41 = arith.mulf %36, %40 : vector<2x8x8xf32>
    "tpu.trace_start"() <{level = 10 : i32, message = "bqk,bkd->bqd"}> : () -> ()
    %cst_14 = arith.constant dense<0.000000e+00> : vector<2x8x8xf32>
    %42 = tpu.matmul %41, %30, %cst_14 {dimension_numbers = #tpu.dot_dimension_numbers<[2], [1], [1], [2], [0, 0, 0, 1, 1, 2], [0], [0]>} : vector<2x8x8xf32>, vector<2x8x8xf32>, vector<2x8x8xf32> -> vector<2x8x8xf32>
    "tpu.trace_stop"() : () -> ()
    %43 = vector.shape_cast %42 : vector<2x8x8xf32> to vector<16x8xf32>
    %44 = vector.extract_strided_slice %4 {offsets = [0, 0], sizes = [8, 32], strides = [1, 1]} : vector<32x32xf32> to vector<8x32xf32>
    %cst_15 = arith.constant dense<0.000000e+00> : vector<16x32xf32>
    %45 = tpu.matmul %43, %44, %cst_15 {dimension_numbers = #tpu.dot_dimension_numbers<[1], [0], [0], [1], [0, 0, 1, 1], [], []>} : vector<16x8xf32>, vector<8x32xf32>, vector<16x32xf32> -> vector<16x32xf32>
    %46 = arith.addf %24, %45 : vector<16x32xf32>
    %47 = vector.extract_strided_slice %21 {offsets = [0, 8], sizes = [16, 8], strides = [1, 1]} : vector<16x32xf32> to vector<16x8xf32>
    %48 = vector.shape_cast %47 : vector<16x8xf32> to vector<2x8x8xf32>
    %49 = vector.extract_strided_slice %22 {offsets = [0, 8], sizes = [16, 8], strides = [1, 1]} : vector<16x32xf32> to vector<16x8xf32>
    %50 = vector.shape_cast %49 : vector<16x8xf32> to vector<2x8x8xf32>
    %51 = vector.extract_strided_slice %23 {offsets = [0, 8], sizes = [16, 8], strides = [1, 1]} : vector<16x32xf32> to vector<16x8xf32>
    %52 = vector.shape_cast %51 : vector<16x8xf32> to vector<2x8x8xf32>
    "tpu.trace_start"() <{level = 10 : i32, message = "bqd,bkd->bqk"}> : () -> ()
    %cst_16 = arith.constant dense<0.000000e+00> : vector<2x8x8xf32>
    %53 = tpu.matmul %48, %50, %cst_16 {dimension_numbers = #tpu.dot_dimension_numbers<[2], [2], [1], [1], [0, 0, 0, 1, 1, 1], [0], [0]>} : vector<2x8x8xf32>, vector<2x8x8xf32>, vector<2x8x8xf32> -> vector<2x8x8xf32>
    "tpu.trace_stop"() : () -> ()
    %cst_17 = arith.constant dense<0xFF800000> : vector<2x8xf32>
    %54 = vector.multi_reduction <maximumf>, %53, %cst_17 [2] : vector<2x8x8xf32> to vector<2x8xf32>
    %55 = vector.shape_cast %54 : vector<2x8xf32> to vector<2x8x1xf32>
    %56 = vector.broadcast %55 : vector<2x8x1xf32> to vector<2x8x8xf32>
    %57 = arith.subf %53, %56 : vector<2x8x8xf32>
    %58 = math.exp %57 : vector<2x8x8xf32>
    %cst_18 = arith.constant dense<0.000000e+00> : vector<2x8xf32>
    %59 = vector.multi_reduction <add>, %58, %cst_18 [2] : vector<2x8x8xf32> to vector<2x8xf32>
    %60 = vector.shape_cast %59 : vector<2x8xf32> to vector<2x8x1xf32>
    %61 = tpu.reciprocal %60 {approx = true} : vector<2x8x1xf32> -> vector<2x8x1xf32>
    %62 = vector.broadcast %61 : vector<2x8x1xf32> to vector<2x8x8xf32>
    %63 = arith.mulf %58, %62 : vector<2x8x8xf32>
    "tpu.trace_start"() <{level = 10 : i32, message = "bqk,bkd->bqd"}> : () -> ()
    %cst_19 = arith.constant dense<0.000000e+00> : vector<2x8x8xf32>
    %64 = tpu.matmul %63, %52, %cst_19 {dimension_numbers = #tpu.dot_dimension_numbers<[2], [1], [1], [2], [0, 0, 0, 1, 1, 2], [0], [0]>} : vector<2x8x8xf32>, vector<2x8x8xf32>, vector<2x8x8xf32> -> vector<2x8x8xf32>
    "tpu.trace_stop"() : () -> ()
    %65 = vector.shape_cast %64 : vector<2x8x8xf32> to vector<16x8xf32>
    %66 = vector.extract_strided_slice %4 {offsets = [8, 0], sizes = [8, 32], strides = [1, 1]} : vector<32x32xf32> to vector<8x32xf32>
    %cst_20 = arith.constant dense<0.000000e+00> : vector<16x32xf32>
    %67 = tpu.matmul %65, %66, %cst_20 {dimension_numbers = #tpu.dot_dimension_numbers<[1], [0], [0], [1], [0, 0, 1, 1], [], []>} : vector<16x8xf32>, vector<8x32xf32>, vector<16x32xf32> -> vector<16x32xf32>
    %68 = arith.addf %46, %67 : vector<16x32xf32>
    %69 = vector.extract_strided_slice %21 {offsets = [0, 16], sizes = [16, 8], strides = [1, 1]} : vector<16x32xf32> to vector<16x8xf32>
    %70 = vector.shape_cast %69 : vector<16x8xf32> to vector<2x8x8xf32>
    %71 = vector.extract_strided_slice %22 {offsets = [0, 16], sizes = [16, 8], strides = [1, 1]} : vector<16x32xf32> to vector<16x8xf32>
    %72 = vector.shape_cast %71 : vector<16x8xf32> to vector<2x8x8xf32>
    %73 = vector.extract_strided_slice %23 {offsets = [0, 16], sizes = [16, 8], strides = [1, 1]} : vector<16x32xf32> to vector<16x8xf32>
    %74 = vector.shape_cast %73 : vector<16x8xf32> to vector<2x8x8xf32>
    "tpu.trace_start"() <{level = 10 : i32, message = "bqd,bkd->bqk"}> : () -> ()
    %cst_21 = arith.constant dense<0.000000e+00> : vector<2x8x8xf32>
    %75 = tpu.matmul %70, %72, %cst_21 {dimension_numbers = #tpu.dot_dimension_numbers<[2], [2], [1], [1], [0, 0, 0, 1, 1, 1], [0], [0]>} : vector<2x8x8xf32>, vector<2x8x8xf32>, vector<2x8x8xf32> -> vector<2x8x8xf32>
    "tpu.trace_stop"() : () -> ()
    %cst_22 = arith.constant dense<0xFF800000> : vector<2x8xf32>
    %76 = vector.multi_reduction <maximumf>, %75, %cst_22 [2] : vector<2x8x8xf32> to vector<2x8xf32>
    %77 = vector.shape_cast %76 : vector<2x8xf32> to vector<2x8x1xf32>
    %78 = vector.broadcast %77 : vector<2x8x1xf32> to vector<2x8x8xf32>
    %79 = arith.subf %75, %78 : vector<2x8x8xf32>
    %80 = math.exp %79 : vector<2x8x8xf32>
    %cst_23 = arith.constant dense<0.000000e+00> : vector<2x8xf32>
    %81 = vector.multi_reduction <add>, %80, %cst_23 [2] : vector<2x8x8xf32> to vector<2x8xf32>
    %82 = vector.shape_cast %81 : vector<2x8xf32> to vector<2x8x1xf32>
    %83 = tpu.reciprocal %82 {approx = true} : vector<2x8x1xf32> -> vector<2x8x1xf32>
    %84 = vector.broadcast %83 : vector<2x8x1xf32> to vector<2x8x8xf32>
    %85 = arith.mulf %80, %84 : vector<2x8x8xf32>
    "tpu.trace_start"() <{level = 10 : i32, message = "bqk,bkd->bqd"}> : () -> ()
    %cst_24 = arith.constant dense<0.000000e+00> : vector<2x8x8xf32>
    %86 = tpu.matmul %85, %74, %cst_24 {dimension_numbers = #tpu.dot_dimension_numbers<[2], [1], [1], [2], [0, 0, 0, 1, 1, 2], [0], [0]>} : vector<2x8x8xf32>, vector<2x8x8xf32>, vector<2x8x8xf32> -> vector<2x8x8xf32>
    "tpu.trace_stop"() : () -> ()
    %87 = vector.shape_cast %86 : vector<2x8x8xf32> to vector<16x8xf32>
    %88 = vector.extract_strided_slice %4 {offsets = [16, 0], sizes = [8, 32], strides = [1, 1]} : vector<32x32xf32> to vector<8x32xf32>
    %cst_25 = arith.constant dense<0.000000e+00> : vector<16x32xf32>
    %89 = tpu.matmul %87, %88, %cst_25 {dimension_numbers = #tpu.dot_dimension_numbers<[1], [0], [0], [1], [0, 0, 1, 1], [], []>} : vector<16x8xf32>, vector<8x32xf32>, vector<16x32xf32> -> vector<16x32xf32>
    %90 = arith.addf %68, %89 : vector<16x32xf32>
    %91 = vector.extract_strided_slice %21 {offsets = [0, 24], sizes = [16, 8], strides = [1, 1]} : vector<16x32xf32> to vector<16x8xf32>
    %92 = vector.shape_cast %91 : vector<16x8xf32> to vector<2x8x8xf32>
    %93 = vector.extract_strided_slice %22 {offsets = [0, 24], sizes = [16, 8], strides = [1, 1]} : vector<16x32xf32> to vector<16x8xf32>
    %94 = vector.shape_cast %93 : vector<16x8xf32> to vector<2x8x8xf32>
    %95 = vector.extract_strided_slice %23 {offsets = [0, 24], sizes = [16, 8], strides = [1, 1]} : vector<16x32xf32> to vector<16x8xf32>
    %96 = vector.shape_cast %95 : vector<16x8xf32> to vector<2x8x8xf32>
    "tpu.trace_start"() <{level = 10 : i32, message = "bqd,bkd->bqk"}> : () -> ()
    %cst_26 = arith.constant dense<0.000000e+00> : vector<2x8x8xf32>
    %97 = tpu.matmul %92, %94, %cst_26 {dimension_numbers = #tpu.dot_dimension_numbers<[2], [2], [1], [1], [0, 0, 0, 1, 1, 1], [0], [0]>} : vector<2x8x8xf32>, vector<2x8x8xf32>, vector<2x8x8xf32> -> vector<2x8x8xf32>
    "tpu.trace_stop"() : () -> ()
    %cst_27 = arith.constant dense<0xFF800000> : vector<2x8xf32>
    %98 = vector.multi_reduction <maximumf>, %97, %cst_27 [2] : vector<2x8x8xf32> to vector<2x8xf32>
    %99 = vector.shape_cast %98 : vector<2x8xf32> to vector<2x8x1xf32>
    %100 = vector.broadcast %99 : vector<2x8x1xf32> to vector<2x8x8xf32>
    %101 = arith.subf %97, %100 : vector<2x8x8xf32>
    %102 = math.exp %101 : vector<2x8x8xf32>
    %cst_28 = arith.constant dense<0.000000e+00> : vector<2x8xf32>
    %103 = vector.multi_reduction <add>, %102, %cst_28 [2] : vector<2x8x8xf32> to vector<2x8xf32>
    %104 = vector.shape_cast %103 : vector<2x8xf32> to vector<2x8x1xf32>
    %105 = tpu.reciprocal %104 {approx = true} : vector<2x8x1xf32> -> vector<2x8x1xf32>
    %106 = vector.broadcast %105 : vector<2x8x1xf32> to vector<2x8x8xf32>
    %107 = arith.mulf %102, %106 : vector<2x8x8xf32>
    "tpu.trace_start"() <{level = 10 : i32, message = "bqk,bkd->bqd"}> : () -> ()
    %cst_29 = arith.constant dense<0.000000e+00> : vector<2x8x8xf32>
    %108 = tpu.matmul %107, %96, %cst_29 {dimension_numbers = #tpu.dot_dimension_numbers<[2], [1], [1], [2], [0, 0, 0, 1, 1, 2], [0], [0]>} : vector<2x8x8xf32>, vector<2x8x8xf32>, vector<2x8x8xf32> -> vector<2x8x8xf32>
    "tpu.trace_stop"() : () -> ()
    %109 = vector.shape_cast %108 : vector<2x8x8xf32> to vector<16x8xf32>
    %110 = vector.extract_strided_slice %4 {offsets = [24, 0], sizes = [8, 32], strides = [1, 1]} : vector<32x32xf32> to vector<8x32xf32>
    %cst_30 = arith.constant dense<0.000000e+00> : vector<16x32xf32>
    %111 = tpu.matmul %109, %110, %cst_30 {dimension_numbers = #tpu.dot_dimension_numbers<[1], [0], [0], [1], [0, 0, 1, 1], [], []>} : vector<16x8xf32>, vector<8x32xf32>, vector<16x32xf32> -> vector<16x32xf32>
    %112 = arith.addf %90, %111 : vector<16x32xf32>
    %113 = arith.addf %0, %112 : vector<16x32xf32>
    %114 = vector.broadcast %11 : vector<1x32xf32> to vector<16x32xf32>
    %115 = arith.addf %113, %114 : vector<16x32xf32>
    %cst_31 = arith.constant dense<0.000000e+00> : vector<16xf32>
    %116 = vector.multi_reduction <add>, %115, %cst_31 [1] : vector<16x32xf32> to vector<16xf32>
    %117 = vector.shape_cast %116 : vector<16xf32> to vector<16x1xf32>
    %cst_32 = arith.constant 3.200000e+01 : f32
    %118 = vector.broadcast %cst_32 : f32 to vector<16x1xf32>
    %119 = arith.divf %117, %118 : vector<16x1xf32>
    %120 = vector.broadcast %119 : vector<16x1xf32> to vector<16x32xf32>
    %121 = arith.subf %115, %120 : vector<16x32xf32>
    %122 = arith.mulf %121, %121 : vector<16x32xf32>
    %cst_33 = arith.constant dense<0.000000e+00> : vector<16xf32>
    %123 = vector.multi_reduction <add>, %122, %cst_33 [1] : vector<16x32xf32> to vector<16xf32>
    %124 = vector.shape_cast %123 : vector<16xf32> to vector<16x1xf32>
    %cst_34 = arith.constant 3.200000e+01 : f32
    %125 = vector.broadcast %cst_34 : f32 to vector<16x1xf32>
    %126 = arith.divf %124, %125 : vector<16x1xf32>
    %127 = vector.broadcast %119 : vector<16x1xf32> to vector<16x32xf32>
    %128 = arith.subf %115, %127 : vector<16x32xf32>
    %cst_35 = arith.constant 9.99999974E-6 : f32
    %129 = vector.broadcast %cst_35 : f32 to vector<16x1xf32>
    %130 = arith.addf %126, %129 : vector<16x1xf32>
    %131 = math.rsqrt %130 : vector<16x1xf32>
    %132 = vector.broadcast %131 : vector<16x1xf32> to vector<16x32xf32>
    %133 = arith.mulf %128, %132 : vector<16x32xf32>
    %134 = vector.broadcast %12 : vector<1x32xf32> to vector<16x32xf32>
    %135 = arith.mulf %133, %134 : vector<16x32xf32>
    %136 = vector.broadcast %13 : vector<1x32xf32> to vector<16x32xf32>
    %137 = arith.addf %135, %136 : vector<16x32xf32>
    %cst_36 = arith.constant dense<0.000000e+00> : vector<16x64xf32>
    %138 = tpu.matmul %137, %5, %cst_36 {dimension_numbers = #tpu.dot_dimension_numbers<[1], [0], [0], [1], [0, 0, 1, 1], [], []>} : vector<16x32xf32>, vector<32x64xf32>, vector<16x64xf32> -> vector<16x64xf32>
    %139 = vector.broadcast %14 : vector<1x64xf32> to vector<16x64xf32>
    %140 = arith.addf %138, %139 : vector<16x64xf32>
    %cst_37 = arith.constant 0.000000e+00 : f32
    %141 = vector.broadcast %cst_37 : f32 to vector<16x64xf32>
    %142 = arith.maximumf %140, %141 : vector<16x64xf32>
    %cst_38 = arith.constant dense<0.000000e+00> : vector<16x32xf32>
    %143 = tpu.matmul %142, %7, %cst_38 {dimension_numbers = #tpu.dot_dimension_numbers<[1], [0], [0], [1], [0, 0, 1, 1], [], []>} : vector<16x64xf32>, vector<64x32xf32>, vector<16x32xf32> -> vector<16x32xf32>
    %144 = vector.broadcast %15 : vector<1x32xf32> to vector<16x32xf32>
    %145 = arith.addf %143, %144 : vector<16x32xf32>
    %146 = arith.addf %137, %145 : vector<16x32xf32>
    %cst_39 = arith.constant dense<0.000000e+00> : vector<16xf32>
    %147 = vector.multi_reduction <add>, %146, %cst_39 [1] : vector<16x32xf32> to vector<16xf32>
    %148 = vector.shape_cast %147 : vector<16xf32> to vector<16x1xf32>
    %cst_40 = arith.constant 3.200000e+01 : f32
    %149 = vector.broadcast %cst_40 : f32 to vector<16x1xf32>
    %150 = arith.divf %148, %149 : vector<16x1xf32>
    %151 = vector.broadcast %150 : vector<16x1xf32> to vector<16x32xf32>
    %152 = arith.subf %146, %151 : vector<16x32xf32>
    %153 = arith.mulf %152, %152 : vector<16x32xf32>
    %cst_41 = arith.constant dense<0.000000e+00> : vector<16xf32>
    %154 = vector.multi_reduction <add>, %153, %cst_41 [1] : vector<16x32xf32> to vector<16xf32>
    %155 = vector.shape_cast %154 : vector<16xf32> to vector<16x1xf32>
    %cst_42 = arith.constant 3.200000e+01 : f32
    %156 = vector.broadcast %cst_42 : f32 to vector<16x1xf32>
    %157 = arith.divf %155, %156 : vector<16x1xf32>
    %158 = vector.broadcast %150 : vector<16x1xf32> to vector<16x32xf32>
    %159 = arith.subf %146, %158 : vector<16x32xf32>
    %cst_43 = arith.constant 9.99999974E-6 : f32
    %160 = vector.broadcast %cst_43 : f32 to vector<16x1xf32>
    %161 = arith.addf %157, %160 : vector<16x1xf32>
    %162 = math.rsqrt %161 : vector<16x1xf32>
    %163 = vector.broadcast %162 : vector<16x1xf32> to vector<16x32xf32>
    %164 = arith.mulf %159, %163 : vector<16x32xf32>
    %165 = vector.broadcast %16 : vector<1x32xf32> to vector<16x32xf32>
    %166 = arith.mulf %164, %165 : vector<16x32xf32>
    %167 = vector.broadcast %17 : vector<1x32xf32> to vector<16x32xf32>
    %168 = arith.addf %166, %167 : vector<16x32xf32>
    %c1 = arith.constant 1 : index
    %c0_44 = arith.constant 0 : index
    %c0_45 = arith.constant 0 : index
    %169 = vector.load %arg2[%c1, %c0_44, %c0_45] : memref<2x32x192xf32, #tpu.memory_space<vmem>>, vector<1x32x192xf32>
    %170 = vector.shape_cast %169 : vector<1x32x192xf32> to vector<32x192xf32>
    %171 = vector.extract_strided_slice %170 {offsets = [0, 0], sizes = [32, 96], strides = [1, 1]} : vector<32x192xf32> to vector<32x96xf32>
    %172 = vector.extract_strided_slice %170 {offsets = [0, 96], sizes = [32, 32], strides = [1, 1]} : vector<32x192xf32> to vector<32x32xf32>
    %173 = vector.extract_strided_slice %170 {offsets = [0, 128], sizes = [32, 64], strides = [1, 1]} : vector<32x192xf32> to vector<32x64xf32>
    %c1_46 = arith.constant 1 : index
    %c0_47 = arith.constant 0 : index
    %c0_48 = arith.constant 0 : index
    %174 = vector.load %arg3[%c1_46, %c0_47, %c0_48] : memref<2x64x32xf32, #tpu.memory_space<vmem>>, vector<1x64x32xf32>
    %175 = vector.shape_cast %174 : vector<1x64x32xf32> to vector<64x32xf32>
    %c1_49 = arith.constant 1 : index
    %c0_50 = arith.constant 0 : index
    %c0_51 = arith.constant 0 : index
    %176 = vector.load %arg4[%c1_49, %c0_50, %c0_51] : memref<2x8x96xf32, #tpu.memory_space<vmem>>, vector<1x8x96xf32>
    %177 = vector.shape_cast %176 : vector<1x8x96xf32> to vector<8x96xf32>
    %178 = vector.extract_strided_slice %177 {offsets = [0, 0], sizes = [1, 96], strides = [1, 1]} : vector<8x96xf32> to vector<1x96xf32>
    %179 = vector.extract_strided_slice %177 {offsets = [1, 0], sizes = [1, 32], strides = [1, 1]} : vector<8x96xf32> to vector<1x32xf32>
    %180 = vector.extract_strided_slice %177 {offsets = [2, 0], sizes = [1, 32], strides = [1, 1]} : vector<8x96xf32> to vector<1x32xf32>
    %181 = vector.extract_strided_slice %177 {offsets = [3, 0], sizes = [1, 32], strides = [1, 1]} : vector<8x96xf32> to vector<1x32xf32>
    %182 = vector.extract_strided_slice %177 {offsets = [4, 0], sizes = [1, 64], strides = [1, 1]} : vector<8x96xf32> to vector<1x64xf32>
    %183 = vector.extract_strided_slice %177 {offsets = [5, 0], sizes = [1, 32], strides = [1, 1]} : vector<8x96xf32> to vector<1x32xf32>
    %184 = vector.extract_strided_slice %177 {offsets = [6, 0], sizes = [1, 32], strides = [1, 1]} : vector<8x96xf32> to vector<1x32xf32>
    %185 = vector.extract_strided_slice %177 {offsets = [7, 0], sizes = [1, 32], strides = [1, 1]} : vector<8x96xf32> to vector<1x32xf32>
    %cst_52 = arith.constant dense<0.000000e+00> : vector<16x96xf32>
    %186 = tpu.matmul %168, %171, %cst_52 {dimension_numbers = #tpu.dot_dimension_numbers<[1], [0], [0], [1], [0, 0, 1, 1], [], []>} : vector<16x32xf32>, vector<32x96xf32>, vector<16x96xf32> -> vector<16x96xf32>
    %187 = vector.broadcast %178 : vector<1x96xf32> to vector<16x96xf32>
    %188 = arith.addf %186, %187 : vector<16x96xf32>
    %189 = vector.extract_strided_slice %188 {offsets = [0, 0], sizes = [16, 32], strides = [1, 1]} : vector<16x96xf32> to vector<16x32xf32>
    %190 = vector.extract_strided_slice %188 {offsets = [0, 32], sizes = [16, 32], strides = [1, 1]} : vector<16x96xf32> to vector<16x32xf32>
    %191 = vector.extract_strided_slice %188 {offsets = [0, 64], sizes = [16, 32], strides = [1, 1]} : vector<16x96xf32> to vector<16x32xf32>
    %cst_53 = arith.constant 0.000000e+00 : f32
    %192 = vector.broadcast %cst_53 : f32 to vector<16x32xf32>
    %193 = vector.extract_strided_slice %189 {offsets = [0, 0], sizes = [16, 8], strides = [1, 1]} : vector<16x32xf32> to vector<16x8xf32>
    %194 = vector.shape_cast %193 : vector<16x8xf32> to vector<2x8x8xf32>
    %195 = vector.extract_strided_slice %190 {offsets = [0, 0], sizes = [16, 8], strides = [1, 1]} : vector<16x32xf32> to vector<16x8xf32>
    %196 = vector.shape_cast %195 : vector<16x8xf32> to vector<2x8x8xf32>
    %197 = vector.extract_strided_slice %191 {offsets = [0, 0], sizes = [16, 8], strides = [1, 1]} : vector<16x32xf32> to vector<16x8xf32>
    %198 = vector.shape_cast %197 : vector<16x8xf32> to vector<2x8x8xf32>
    "tpu.trace_start"() <{level = 10 : i32, message = "bqd,bkd->bqk"}> : () -> ()
    %cst_54 = arith.constant dense<0.000000e+00> : vector<2x8x8xf32>
    %199 = tpu.matmul %194, %196, %cst_54 {dimension_numbers = #tpu.dot_dimension_numbers<[2], [2], [1], [1], [0, 0, 0, 1, 1, 1], [0], [0]>} : vector<2x8x8xf32>, vector<2x8x8xf32>, vector<2x8x8xf32> -> vector<2x8x8xf32>
    "tpu.trace_stop"() : () -> ()
    %cst_55 = arith.constant dense<0xFF800000> : vector<2x8xf32>
    %200 = vector.multi_reduction <maximumf>, %199, %cst_55 [2] : vector<2x8x8xf32> to vector<2x8xf32>
    %201 = vector.shape_cast %200 : vector<2x8xf32> to vector<2x8x1xf32>
    %202 = vector.broadcast %201 : vector<2x8x1xf32> to vector<2x8x8xf32>
    %203 = arith.subf %199, %202 : vector<2x8x8xf32>
    %204 = math.exp %203 : vector<2x8x8xf32>
    %cst_56 = arith.constant dense<0.000000e+00> : vector<2x8xf32>
    %205 = vector.multi_reduction <add>, %204, %cst_56 [2] : vector<2x8x8xf32> to vector<2x8xf32>
    %206 = vector.shape_cast %205 : vector<2x8xf32> to vector<2x8x1xf32>
    %207 = tpu.reciprocal %206 {approx = true} : vector<2x8x1xf32> -> vector<2x8x1xf32>
    %208 = vector.broadcast %207 : vector<2x8x1xf32> to vector<2x8x8xf32>
    %209 = arith.mulf %204, %208 : vector<2x8x8xf32>
    "tpu.trace_start"() <{level = 10 : i32, message = "bqk,bkd->bqd"}> : () -> ()
    %cst_57 = arith.constant dense<0.000000e+00> : vector<2x8x8xf32>
    %210 = tpu.matmul %209, %198, %cst_57 {dimension_numbers = #tpu.dot_dimension_numbers<[2], [1], [1], [2], [0, 0, 0, 1, 1, 2], [0], [0]>} : vector<2x8x8xf32>, vector<2x8x8xf32>, vector<2x8x8xf32> -> vector<2x8x8xf32>
    "tpu.trace_stop"() : () -> ()
    %211 = vector.shape_cast %210 : vector<2x8x8xf32> to vector<16x8xf32>
    %212 = vector.extract_strided_slice %172 {offsets = [0, 0], sizes = [8, 32], strides = [1, 1]} : vector<32x32xf32> to vector<8x32xf32>
    %cst_58 = arith.constant dense<0.000000e+00> : vector<16x32xf32>
    %213 = tpu.matmul %211, %212, %cst_58 {dimension_numbers = #tpu.dot_dimension_numbers<[1], [0], [0], [1], [0, 0, 1, 1], [], []>} : vector<16x8xf32>, vector<8x32xf32>, vector<16x32xf32> -> vector<16x32xf32>
    %214 = arith.addf %192, %213 : vector<16x32xf32>
    %215 = vector.extract_strided_slice %189 {offsets = [0, 8], sizes = [16, 8], strides = [1, 1]} : vector<16x32xf32> to vector<16x8xf32>
    %216 = vector.shape_cast %215 : vector<16x8xf32> to vector<2x8x8xf32>
    %217 = vector.extract_strided_slice %190 {offsets = [0, 8], sizes = [16, 8], strides = [1, 1]} : vector<16x32xf32> to vector<16x8xf32>
    %218 = vector.shape_cast %217 : vector<16x8xf32> to vector<2x8x8xf32>
    %219 = vector.extract_strided_slice %191 {offsets = [0, 8], sizes = [16, 8], strides = [1, 1]} : vector<16x32xf32> to vector<16x8xf32>
    %220 = vector.shape_cast %219 : vector<16x8xf32> to vector<2x8x8xf32>
    "tpu.trace_start"() <{level = 10 : i32, message = "bqd,bkd->bqk"}> : () -> ()
    %cst_59 = arith.constant dense<0.000000e+00> : vector<2x8x8xf32>
    %221 = tpu.matmul %216, %218, %cst_59 {dimension_numbers = #tpu.dot_dimension_numbers<[2], [2], [1], [1], [0, 0, 0, 1, 1, 1], [0], [0]>} : vector<2x8x8xf32>, vector<2x8x8xf32>, vector<2x8x8xf32> -> vector<2x8x8xf32>
    "tpu.trace_stop"() : () -> ()
    %cst_60 = arith.constant dense<0xFF800000> : vector<2x8xf32>
    %222 = vector.multi_reduction <maximumf>, %221, %cst_60 [2] : vector<2x8x8xf32> to vector<2x8xf32>
    %223 = vector.shape_cast %222 : vector<2x8xf32> to vector<2x8x1xf32>
    %224 = vector.broadcast %223 : vector<2x8x1xf32> to vector<2x8x8xf32>
    %225 = arith.subf %221, %224 : vector<2x8x8xf32>
    %226 = math.exp %225 : vector<2x8x8xf32>
    %cst_61 = arith.constant dense<0.000000e+00> : vector<2x8xf32>
    %227 = vector.multi_reduction <add>, %226, %cst_61 [2] : vector<2x8x8xf32> to vector<2x8xf32>
    %228 = vector.shape_cast %227 : vector<2x8xf32> to vector<2x8x1xf32>
    %229 = tpu.reciprocal %228 {approx = true} : vector<2x8x1xf32> -> vector<2x8x1xf32>
    %230 = vector.broadcast %229 : vector<2x8x1xf32> to vector<2x8x8xf32>
    %231 = arith.mulf %226, %230 : vector<2x8x8xf32>
    "tpu.trace_start"() <{level = 10 : i32, message = "bqk,bkd->bqd"}> : () -> ()
    %cst_62 = arith.constant dense<0.000000e+00> : vector<2x8x8xf32>
    %232 = tpu.matmul %231, %220, %cst_62 {dimension_numbers = #tpu.dot_dimension_numbers<[2], [1], [1], [2], [0, 0, 0, 1, 1, 2], [0], [0]>} : vector<2x8x8xf32>, vector<2x8x8xf32>, vector<2x8x8xf32> -> vector<2x8x8xf32>
    "tpu.trace_stop"() : () -> ()
    %233 = vector.shape_cast %232 : vector<2x8x8xf32> to vector<16x8xf32>
    %234 = vector.extract_strided_slice %172 {offsets = [8, 0], sizes = [8, 32], strides = [1, 1]} : vector<32x32xf32> to vector<8x32xf32>
    %cst_63 = arith.constant dense<0.000000e+00> : vector<16x32xf32>
    %235 = tpu.matmul %233, %234, %cst_63 {dimension_numbers = #tpu.dot_dimension_numbers<[1], [0], [0], [1], [0, 0, 1, 1], [], []>} : vector<16x8xf32>, vector<8x32xf32>, vector<16x32xf32> -> vector<16x32xf32>
    %236 = arith.addf %214, %235 : vector<16x32xf32>
    %237 = vector.extract_strided_slice %189 {offsets = [0, 16], sizes = [16, 8], strides = [1, 1]} : vector<16x32xf32> to vector<16x8xf32>
    %238 = vector.shape_cast %237 : vector<16x8xf32> to vector<2x8x8xf32>
    %239 = vector.extract_strided_slice %190 {offsets = [0, 16], sizes = [16, 8], strides = [1, 1]} : vector<16x32xf32> to vector<16x8xf32>
    %240 = vector.shape_cast %239 : vector<16x8xf32> to vector<2x8x8xf32>
    %241 = vector.extract_strided_slice %191 {offsets = [0, 16], sizes = [16, 8], strides = [1, 1]} : vector<16x32xf32> to vector<16x8xf32>
    %242 = vector.shape_cast %241 : vector<16x8xf32> to vector<2x8x8xf32>
    "tpu.trace_start"() <{level = 10 : i32, message = "bqd,bkd->bqk"}> : () -> ()
    %cst_64 = arith.constant dense<0.000000e+00> : vector<2x8x8xf32>
    %243 = tpu.matmul %238, %240, %cst_64 {dimension_numbers = #tpu.dot_dimension_numbers<[2], [2], [1], [1], [0, 0, 0, 1, 1, 1], [0], [0]>} : vector<2x8x8xf32>, vector<2x8x8xf32>, vector<2x8x8xf32> -> vector<2x8x8xf32>
    "tpu.trace_stop"() : () -> ()
    %cst_65 = arith.constant dense<0xFF800000> : vector<2x8xf32>
    %244 = vector.multi_reduction <maximumf>, %243, %cst_65 [2] : vector<2x8x8xf32> to vector<2x8xf32>
    %245 = vector.shape_cast %244 : vector<2x8xf32> to vector<2x8x1xf32>
    %246 = vector.broadcast %245 : vector<2x8x1xf32> to vector<2x8x8xf32>
    %247 = arith.subf %243, %246 : vector<2x8x8xf32>
    %248 = math.exp %247 : vector<2x8x8xf32>
    %cst_66 = arith.constant dense<0.000000e+00> : vector<2x8xf32>
    %249 = vector.multi_reduction <add>, %248, %cst_66 [2] : vector<2x8x8xf32> to vector<2x8xf32>
    %250 = vector.shape_cast %249 : vector<2x8xf32> to vector<2x8x1xf32>
    %251 = tpu.reciprocal %250 {approx = true} : vector<2x8x1xf32> -> vector<2x8x1xf32>
    %252 = vector.broadcast %251 : vector<2x8x1xf32> to vector<2x8x8xf32>
    %253 = arith.mulf %248, %252 : vector<2x8x8xf32>
    "tpu.trace_start"() <{level = 10 : i32, message = "bqk,bkd->bqd"}> : () -> ()
    %cst_67 = arith.constant dense<0.000000e+00> : vector<2x8x8xf32>
    %254 = tpu.matmul %253, %242, %cst_67 {dimension_numbers = #tpu.dot_dimension_numbers<[2], [1], [1], [2], [0, 0, 0, 1, 1, 2], [0], [0]>} : vector<2x8x8xf32>, vector<2x8x8xf32>, vector<2x8x8xf32> -> vector<2x8x8xf32>
    "tpu.trace_stop"() : () -> ()
    %255 = vector.shape_cast %254 : vector<2x8x8xf32> to vector<16x8xf32>
    %256 = vector.extract_strided_slice %172 {offsets = [16, 0], sizes = [8, 32], strides = [1, 1]} : vector<32x32xf32> to vector<8x32xf32>
    %cst_68 = arith.constant dense<0.000000e+00> : vector<16x32xf32>
    %257 = tpu.matmul %255, %256, %cst_68 {dimension_numbers = #tpu.dot_dimension_numbers<[1], [0], [0], [1], [0, 0, 1, 1], [], []>} : vector<16x8xf32>, vector<8x32xf32>, vector<16x32xf32> -> vector<16x32xf32>
    %258 = arith.addf %236, %257 : vector<16x32xf32>
    %259 = vector.extract_strided_slice %189 {offsets = [0, 24], sizes = [16, 8], strides = [1, 1]} : vector<16x32xf32> to vector<16x8xf32>
    %260 = vector.shape_cast %259 : vector<16x8xf32> to vector<2x8x8xf32>
    %261 = vector.extract_strided_slice %190 {offsets = [0, 24], sizes = [16, 8], strides = [1, 1]} : vector<16x32xf32> to vector<16x8xf32>
    %262 = vector.shape_cast %261 : vector<16x8xf32> to vector<2x8x8xf32>
    %263 = vector.extract_strided_slice %191 {offsets = [0, 24], sizes = [16, 8], strides = [1, 1]} : vector<16x32xf32> to vector<16x8xf32>
    %264 = vector.shape_cast %263 : vector<16x8xf32> to vector<2x8x8xf32>
    "tpu.trace_start"() <{level = 10 : i32, message = "bqd,bkd->bqk"}> : () -> ()
    %cst_69 = arith.constant dense<0.000000e+00> : vector<2x8x8xf32>
    %265 = tpu.matmul %260, %262, %cst_69 {dimension_numbers = #tpu.dot_dimension_numbers<[2], [2], [1], [1], [0, 0, 0, 1, 1, 1], [0], [0]>} : vector<2x8x8xf32>, vector<2x8x8xf32>, vector<2x8x8xf32> -> vector<2x8x8xf32>
    "tpu.trace_stop"() : () -> ()
    %cst_70 = arith.constant dense<0xFF800000> : vector<2x8xf32>
    %266 = vector.multi_reduction <maximumf>, %265, %cst_70 [2] : vector<2x8x8xf32> to vector<2x8xf32>
    %267 = vector.shape_cast %266 : vector<2x8xf32> to vector<2x8x1xf32>
    %268 = vector.broadcast %267 : vector<2x8x1xf32> to vector<2x8x8xf32>
    %269 = arith.subf %265, %268 : vector<2x8x8xf32>
    %270 = math.exp %269 : vector<2x8x8xf32>
    %cst_71 = arith.constant dense<0.000000e+00> : vector<2x8xf32>
    %271 = vector.multi_reduction <add>, %270, %cst_71 [2] : vector<2x8x8xf32> to vector<2x8xf32>
    %272 = vector.shape_cast %271 : vector<2x8xf32> to vector<2x8x1xf32>
    %273 = tpu.reciprocal %272 {approx = true} : vector<2x8x1xf32> -> vector<2x8x1xf32>
    %274 = vector.broadcast %273 : vector<2x8x1xf32> to vector<2x8x8xf32>
    %275 = arith.mulf %270, %274 : vector<2x8x8xf32>
    "tpu.trace_start"() <{level = 10 : i32, message = "bqk,bkd->bqd"}> : () -> ()
    %cst_72 = arith.constant dense<0.000000e+00> : vector<2x8x8xf32>
    %276 = tpu.matmul %275, %264, %cst_72 {dimension_numbers = #tpu.dot_dimension_numbers<[2], [1], [1], [2], [0, 0, 0, 1, 1, 2], [0], [0]>} : vector<2x8x8xf32>, vector<2x8x8xf32>, vector<2x8x8xf32> -> vector<2x8x8xf32>
    "tpu.trace_stop"() : () -> ()
    %277 = vector.shape_cast %276 : vector<2x8x8xf32> to vector<16x8xf32>
    %278 = vector.extract_strided_slice %172 {offsets = [24, 0], sizes = [8, 32], strides = [1, 1]} : vector<32x32xf32> to vector<8x32xf32>
    %cst_73 = arith.constant dense<0.000000e+00> : vector<16x32xf32>
    %279 = tpu.matmul %277, %278, %cst_73 {dimension_numbers = #tpu.dot_dimension_numbers<[1], [0], [0], [1], [0, 0, 1, 1], [], []>} : vector<16x8xf32>, vector<8x32xf32>, vector<16x32xf32> -> vector<16x32xf32>
    %280 = arith.addf %258, %279 : vector<16x32xf32>
    %281 = arith.addf %168, %280 : vector<16x32xf32>
    %282 = vector.broadcast %179 : vector<1x32xf32> to vector<16x32xf32>
    %283 = arith.addf %281, %282 : vector<16x32xf32>
    %cst_74 = arith.constant dense<0.000000e+00> : vector<16xf32>
    %284 = vector.multi_reduction <add>, %283, %cst_74 [1] : vector<16x32xf32> to vector<16xf32>
    %285 = vector.shape_cast %284 : vector<16xf32> to vector<16x1xf32>
    %cst_75 = arith.constant 3.200000e+01 : f32
    %286 = vector.broadcast %cst_75 : f32 to vector<16x1xf32>
    %287 = arith.divf %285, %286 : vector<16x1xf32>
    %288 = vector.broadcast %287 : vector<16x1xf32> to vector<16x32xf32>
    %289 = arith.subf %283, %288 : vector<16x32xf32>
    %290 = arith.mulf %289, %289 : vector<16x32xf32>
    %cst_76 = arith.constant dense<0.000000e+00> : vector<16xf32>
    %291 = vector.multi_reduction <add>, %290, %cst_76 [1] : vector<16x32xf32> to vector<16xf32>
    %292 = vector.shape_cast %291 : vector<16xf32> to vector<16x1xf32>
    %cst_77 = arith.constant 3.200000e+01 : f32
    %293 = vector.broadcast %cst_77 : f32 to vector<16x1xf32>
    %294 = arith.divf %292, %293 : vector<16x1xf32>
    %295 = vector.broadcast %287 : vector<16x1xf32> to vector<16x32xf32>
    %296 = arith.subf %283, %295 : vector<16x32xf32>
    %cst_78 = arith.constant 9.99999974E-6 : f32
    %297 = vector.broadcast %cst_78 : f32 to vector<16x1xf32>
    %298 = arith.addf %294, %297 : vector<16x1xf32>
    %299 = math.rsqrt %298 : vector<16x1xf32>
    %300 = vector.broadcast %299 : vector<16x1xf32> to vector<16x32xf32>
    %301 = arith.mulf %296, %300 : vector<16x32xf32>
    %302 = vector.broadcast %180 : vector<1x32xf32> to vector<16x32xf32>
    %303 = arith.mulf %301, %302 : vector<16x32xf32>
    %304 = vector.broadcast %181 : vector<1x32xf32> to vector<16x32xf32>
    %305 = arith.addf %303, %304 : vector<16x32xf32>
    %cst_79 = arith.constant dense<0.000000e+00> : vector<16x64xf32>
    %306 = tpu.matmul %305, %173, %cst_79 {dimension_numbers = #tpu.dot_dimension_numbers<[1], [0], [0], [1], [0, 0, 1, 1], [], []>} : vector<16x32xf32>, vector<32x64xf32>, vector<16x64xf32> -> vector<16x64xf32>
    %307 = vector.broadcast %182 : vector<1x64xf32> to vector<16x64xf32>
    %308 = arith.addf %306, %307 : vector<16x64xf32>
    %cst_80 = arith.constant 0.000000e+00 : f32
    %309 = vector.broadcast %cst_80 : f32 to vector<16x64xf32>
    %310 = arith.maximumf %308, %309 : vector<16x64xf32>
    %cst_81 = arith.constant dense<0.000000e+00> : vector<16x32xf32>
    %311 = tpu.matmul %310, %175, %cst_81 {dimension_numbers = #tpu.dot_dimension_numbers<[1], [0], [0], [1], [0, 0, 1, 1], [], []>} : vector<16x64xf32>, vector<64x32xf32>, vector<16x32xf32> -> vector<16x32xf32>
    %312 = vector.broadcast %183 : vector<1x32xf32> to vector<16x32xf32>
    %313 = arith.addf %311, %312 : vector<16x32xf32>
    %314 = arith.addf %305, %313 : vector<16x32xf32>
    %cst_82 = arith.constant dense<0.000000e+00> : vector<16xf32>
    %315 = vector.multi_reduction <add>, %314, %cst_82 [1] : vector<16x32xf32> to vector<16xf32>
    %316 = vector.shape_cast %315 : vector<16xf32> to vector<16x1xf32>
    %cst_83 = arith.constant 3.200000e+01 : f32
    %317 = vector.broadcast %cst_83 : f32 to vector<16x1xf32>
    %318 = arith.divf %316, %317 : vector<16x1xf32>
    %319 = vector.broadcast %318 : vector<16x1xf32> to vector<16x32xf32>
    %320 = arith.subf %314, %319 : vector<16x32xf32>
    %321 = arith.mulf %320, %320 : vector<16x32xf32>
    %cst_84 = arith.constant dense<0.000000e+00> : vector<16xf32>
    %322 = vector.multi_reduction <add>, %321, %cst_84 [1] : vector<16x32xf32> to vector<16xf32>
    %323 = vector.shape_cast %322 : vector<16xf32> to vector<16x1xf32>
    %cst_85 = arith.constant 3.200000e+01 : f32
    %324 = vector.broadcast %cst_85 : f32 to vector<16x1xf32>
    %325 = arith.divf %323, %324 : vector<16x1xf32>
    %326 = vector.broadcast %318 : vector<16x1xf32> to vector<16x32xf32>
    %327 = arith.subf %314, %326 : vector<16x32xf32>
    %cst_86 = arith.constant 9.99999974E-6 : f32
    %328 = vector.broadcast %cst_86 : f32 to vector<16x1xf32>
    %329 = arith.addf %325, %328 : vector<16x1xf32>
    %330 = math.rsqrt %329 : vector<16x1xf32>
    %331 = vector.broadcast %330 : vector<16x1xf32> to vector<16x32xf32>
    %332 = arith.mulf %327, %331 : vector<16x32xf32>
    %333 = vector.broadcast %184 : vector<1x32xf32> to vector<16x32xf32>
    %334 = arith.mulf %332, %333 : vector<16x32xf32>
    %335 = vector.broadcast %185 : vector<1x32xf32> to vector<16x32xf32>
    %336 = arith.addf %334, %335 : vector<16x32xf32>
    %337 = vector.shape_cast %336 : vector<16x32xf32> to vector<2x8x32xf32>
    %cst_87 = arith.constant dense<0.000000e+00> : vector<2x32xf32>
    %338 = vector.multi_reduction <add>, %337, %cst_87 [1] : vector<2x8x32xf32> to vector<2x32xf32>
    %cst_88 = arith.constant 8.000000e+00 : f32
    %339 = vector.broadcast %cst_88 : f32 to vector<2x32xf32>
    %340 = arith.divf %338, %339 : vector<2x32xf32>
    %c0_89 = arith.constant 0 : index
    %c0_90 = arith.constant 0 : index
    %341 = vector.load %arg5[%c0_89, %c0_90] : memref<1x32xf32, #tpu.memory_space<vmem>>, vector<1x32xf32>
    %342 = vector.broadcast %341 : vector<1x32xf32> to vector<2x32xf32>
    %343 = arith.mulf %340, %342 : vector<2x32xf32>
    %cst_91 = arith.constant dense<0.000000e+00> : vector<2xf32>
    %344 = vector.multi_reduction <add>, %343, %cst_91 [1] : vector<2x32xf32> to vector<2xf32>
    %345 = vector.shape_cast %344 : vector<2xf32> to vector<2x1xf32>
    %c0_92 = arith.constant 0 : index
    %c0_93 = arith.constant 0 : index
    %346 = vector.load %arg6[%c0_92, %c0_93] : memref<1x1xf32, #tpu.memory_space<vmem>>, vector<1x1xf32>
    %347 = vector.broadcast %346 : vector<1x1xf32> to vector<2x1xf32>
    %348 = arith.addf %345, %347 : vector<2x1xf32>
    %c0_94 = arith.constant 0 : index
    %c0_95 = arith.constant 0 : index
    %349 = vector.load %arg7[%c0_94, %c0_95] : memref<2x1xf32, #tpu.memory_space<vmem>>, vector<2x1xf32>
    tpu.vector_store %arg7[%c0_94, %c0_95], %348 {strides = array<i32>} : memref<2x1xf32, #tpu.memory_space<vmem>>, vector<2x1xf32>,
    return
  }
  func.func @transform_0(%arg0: i32) -> (i32, i32) {
    %c0_i32 = arith.constant 0 : i32
    %c0_i32_0 = arith.constant 0 : i32
    %c0_i32_1 = arith.constant 0 : i32
    return %c0_i32, %c0_i32_0 : i32, i32
  }
  func.func @transform_1(%arg0: i32) -> (i32, i32, i32) {
    %c0_i32 = arith.constant 0 : i32
    %c0_i32_0 = arith.constant 0 : i32
    %c0_i32_1 = arith.constant 0 : i32
    %c0_i32_2 = arith.constant 0 : i32
    return %c0_i32, %c0_i32_0, %c0_i32_1 : i32, i32, i32
  }
  func.func @transform_2(%arg0: i32) -> (i32, i32, i32) {
    %c0_i32 = arith.constant 0 : i32
    %c0_i32_0 = arith.constant 0 : i32
    %c0_i32_1 = arith.constant 0 : i32
    %c0_i32_2 = arith.constant 0 : i32
    return %c0_i32, %c0_i32_0, %c0_i32_1 : i32, i32, i32
  }
  func.func @transform_3(%arg0: i32) -> (i32, i32, i32) {
    %c0_i32 = arith.constant 0 : i32
    %c0_i32_0 = arith.constant 0 : i32
    %c0_i32_1 = arith.constant 0 : i32
    %c0_i32_2 = arith.constant 0 : i32
    return %c0_i32, %c0_i32_0, %c0_i32_1 : i32, i32, i32
  }
  func.func @transform_4(%arg0: i32) -> (i32, i32) {
    %c0_i32 = arith.constant 0 : i32
    %c0_i32_0 = arith.constant 0 : i32
    %c0_i32_1 = arith.constant 0 : i32
    return %c0_i32, %c0_i32_0 : i32, i32
  }
  func.func @transform_5(%arg0: i32) -> (i32, i32) {
    %c0_i32 = arith.constant 0 : i32
    %c0_i32_0 = arith.constant 0 : i32
    %c0_i32_1 = arith.constant 0 : i32
    return %c0_i32, %c0_i32_0 : i32, i32
  }
  func.func @transform_6(%arg0: i32) -> (i32, i32) {
    %c0_i32 = arith.constant 0 : i32
    %c0_i32_0 = arith.constant 0 : i32
    %c0_i32_1 = arith.constant 0 : i32
    return %c0_i32, %c0_i32_0 : i32, i32
  }
}

</mosaic_0001>

<bundles_post_ra>
// kernel: tpu_custom_call.1
= control target key start
LH: loop header
LB: loop body
LE: loop exit
PB: predicated region body
PF: predicated region fallthrough
CT: control target
= control target key end

     0   :  { %vm45_vm0 = vcmask 261120   ;;  %s2033_s11 = smov 64   ;;  %s2034_s12 = smov 96   ;;  %vm78_vm1 = vcmask 64512   ;;  %vm825_vm6 = vcmask 523264   ;;  %s2556_s1 = inlined_call_operand.vmem [shape: f32[2,32,192], index: 1, kind: input, shape index: {}]   ;;  %s2557_s0 = inlined_call_operand.vmem [shape: f32[16,32], index: 0, kind: input, shape index: {}]   ;;  %s2558_s3 = inlined_call_operand.vmem [shape: f32[2,8,96], index: 3, kind: input, shape index: {}]   ;;  %s2559_s2 = inlined_call_operand.vmem [shape: f32[2,64,32], index: 2, kind: input, shape index: {}]   ;;  %s2560_s4 = inlined_call_operand.vmem [shape: f32[1,32], index: 4, kind: input, shape index: {}]   ;;  %s2561_s5 = inlined_call_operand.<no memory space> [shape: f32[1,1], index: 5, kind: input, shape index: {}]   ;;  %s2562_s6 = inlined_call_operand.vmem [shape: f32[2,1], index: 6, kind: output, shape index: {}]  }
   0x1   :  { %v2085_v0 = vld [vmem:[%s2556_s1 + $0x30] sm:$0xff]  ;;  %v2090_v1 = vld [vmem:[%s2556_s1 + $0x20] sm:$0xff]  ;;  %v2115_v6 = vld [vmem:[%s2557_s0 + $0x8] sm:$0xff]  ;;  %s2036_s13 = smov 120   ;;  %s2037_s14 = smov 112  }
   0x2   :  { %64 = vmatpush.msra.mxu0 %v2085_v0  ;;  %v1937_v2 = vpack.i.bf16 %v2085_v0, %v2090_v1  ;;  %v2098_v3 = vld [vmem:[%s2556_s1 + $0x10] sm:$0xff]  ;;  %v27_v4 = vld [vmem:[%s2556_s1] sm:$0xff]  ;;  %s2038_s15 = smov 56   ;;  %s2039_s16 = smov 32  }
   0x3   :  { %v2108_v5 = vld [vmem:[%s2557_s0] sm:$0xff]  ;;  %s2035_s0 = smov 88   ;;  %s2040_s17 = smov 80  }
   0x4   :  { %65 = vmatpush.msra.mxu0 %v2090_v1  ;;  %v2122_v7 = vld [vmem:[%s2558_s3] sm:$0xff]  ;;  %s2041_s18 = smov 72   ;;  %s2042_s19 = smov 104  }
   0x5   :  { %v44_v8 = vperm.slane %v2122_v7, 0  ;;  %s2043_s20 = smov 48   ;;  %s2044_s21 = smov 40  }
   0x6   :  { %66 = vmatpush.msra.mxu0 %v2098_v3 }
   0x8   :  { %67 = vmatpush.msra.mxu0 %v27_v4 }
   0x9   :  { %1830 = vmatmul.msk.f32.vlgmr.msra.gmra.mxu0 %vm45_vm0, %v2108_v5 }
  0x11   :  { %1831 = vmatmul.msk.f32.gmra.mxu0 %vm45_vm0, %v2115_v6 }
  0x86   :  { %v69_v9 = vpop.f32.mrf.mxu0 }
  0x87   :  { %v2125_v10 = vadd.f32 %v69_v9, %v44_v8 }
  0x89   :  { %152 = vrot.lane.b32.xlu2 %v2125_v10, %s2033_s11  ;;  %76 = vrot.lane.b32.xlu0 %v2125_v10, %s2034_s12 }
  0x8e   :  { %v72_v11 = vpop.f32.mrf.mxu0 }
  0x8f   :  { %v2131_v12 = vadd.f32 %v72_v11, %v44_v8 }
  0x91   :  { %104 = vrot.lane.b32.xlu1 %v2131_v12, %s2034_s12  ;;  %206 = vrot.lane.b32.xlu2 %v2125_v10, %s2035_s0 }
  0x99   :  { %204 = vrot.lane.b32.xlu2 %v2125_v10, %s2036_s13 }
  0xa1   :  { %234 = vrot.lane.b32.xlu2 %v2131_v12, %s2035_s0 }
  0xa9   :  { %232 = vrot.lane.b32.xlu2 %v2131_v12, %s2036_s13 }
  0xe3   :  { %v153_v13 = vpop.permute.xlu2 %152 }
  0xeb   :  { %v207_v15 = vpop.permute.xlu2 %206 }
  0xf3   :  { %v205_v21 = vpop.permute.xlu2 %204 }
  0xfb   :  { %v77_v14 = vpop.permute.xlu0 %76  ;;  %v235_v22 = vpop.permute.xlu2 %234 }
  0xfc   :  { %1832 = vmatpush.xpose.msk.msra.mxu1 %vm78_vm1, %v77_v14 }
  0xff   :  { %1833 = vmatmul.msk.f32.vlgmr.msra.gmra.mxu1 %vm78_vm1, %v2125_v10 }
 0x100   :  { %173 = vmatpush.msrb.mxu1 %v153_v13 }
 0x102   :  { %1838 = vmatpush.xpose.msk.msra.mxu1 %vm78_vm1, %v207_v15 }
 0x103   :  { %v105_v16 = vpop.permute.xlu1 %104  ;;  %v233_v23 = vpop.permute.xlu2 %232 }
 0x104   :  { %1834 = vmatpush.xpose.msk.msra.mxu2 %vm78_vm1, %v105_v16 }
 0x107   :  { %1835 = vmatmul.msk.f32.vlgmr.msra.gmra.mxu2 %vm78_vm1, %v2131_v12 }
 0x108   :  { %1840 = vmatpush.xpose.msk.msrb.mxu2 %vm78_vm1, %v235_v22 }
 0x10f   :  { %1841 = vmatmul.msk.f32.vlgmr.msrb.gmra.mxu2 %vm78_vm1, %v233_v23 }
 0x17c   :  { %v100_v17 = vpop.f32.mrf.mxu1 }
 0x17d   :  { %v130_v18 = vsel %vm78_vm1, %v100_v17, -inf }
 0x17e   :  { %131 = vmax.xlane.f32.xlu0 %v130_v18 }
 0x18a   :  { %v127_v19 = vpop.f32.mrf.mxu2 }
 0x18b   :  { %v133_v20 = vsel %vm78_vm1, %v127_v19, -inf }
 0x18c   :  { %134 = vmax.xlane.f32.xlu2 %v133_v20 }
 0x192   :  { %v257_v45 = vpop.f32.mrf.mxu2 }
 0x193   :  { %v263_v46 = vsel %vm78_vm1, %v257_v45, -inf }
 0x1a4   :  { %400 = vrot.lane.b32.xlu2 %v2125_v10, %s2037_s14 }
 0x1ac   :  { %308 = vrot.lane.b32.xlu2 %v2131_v12, %s2038_s15 }
 0x1b4   :  { %368 = vrot.lane.b32.xlu2 %v27_v4, %s2039_s16 }
 0x1bc   :  { %430 = vrot.lane.b32.xlu2 %v2131_v12, %s2040_s17 }
 0x1c4   :  { %567 = vrot.lane.b32.xlu2 %v2125_v10, %s2041_s18 }
 0x1f1   :  { %v132_v24 = vpop.xlane.xlu0 %131 }
 0x1f2   :  { %v136_v25 = vsub.f32 %v100_v17, %v132_v24 }
 0x1f4   :  { %v138_v26 = vmul.f32 1.442695, %v136_v25 }
 0x1f6   :  { %1949 = vpow2.f32 %v138_v26 }
 0x1fc   :  { %v1950_v27 = vpop.eup %1949 }
 0x1fd   :  { %v142_v28 = vsel %vm78_vm1, %v1950_v27, 0.0 }
 0x1fe   :  { %143 = vadd.xlane.f32.xlu1 %v142_v28 }
 0x1ff   :  { %v135_v29 = vpop.xlane.xlu2 %134 }
 0x200   :  { %v137_v30 = vsub.f32 %v127_v19, %v135_v29 }
 0x202   :  { %v140_v31 = vmul.f32 1.442695, %v137_v30 }
 0x204   :  { %1951 = vpow2.f32 %v140_v31 }
 0x207   :  { %v2164_v32 = vpop.permute.xlu2 %400 }
 0x20a   :  { %v1952_v33 = vpop.eup %1951 }
 0x20b   :  { %v145_v34 = vsel %vm78_vm1, %v1952_v33, 0.0 }
 0x20c   :  { %146 = vadd.xlane.f32.xlu1 %v145_v34 }
 0x20f   :  { %v309_v35 = vpop.permute.xlu2 %308 }
 0x217   :  { %v369_v36 = vpop.permute.xlu2 %368 }
 0x218   :  { %392 = vmatpush.msrb.mxu0 %v369_v36 }
 0x21f   :  { %v431_v37 = vpop.permute.xlu2 %430 }
 0x227   :  { %v568_v38 = vpop.permute.xlu2 %567 }
 0x228   :  { %1856 = vmatpush.xpose.msk.msra.mxu0 %vm78_vm1, %v568_v38 }
 0x271   :  { %v144_v39 = vpop.xlane.xlu1 %143 }
 0x272   :  { %1953 = vrcp.f32 %v144_v39 }
 0x278   :  { %v1954_v40 = vpop.eup %1953 }
 0x279   :  { %v150_v41 = vmul.f32 %v1954_v40, %v1950_v27 }
 0x27b   :  { %1836 = vmatmul.msk.f32.vlgmr.msrb.gmra.mxu1 %vm78_vm1, %v150_v41 }
 0x27c   :  { %329 = vmatpush.msrb.mxu1 %v309_v35 }
 0x27f   :  { %v147_v50 = vpop.xlane.xlu1 %146 }
 0x283   :  { %1839 = vmatmul.msk.f32.vlgmr.msra.gmra.mxu1 %vm78_vm1, %v205_v21 }
 0x284   :  { %1850 = vmatpush.xpose.msk.msra.mxu1 %vm78_vm1, %v431_v37 }
 0x2f8   :  { %v175_v42 = vpop.f32.mrf.mxu1 }
 0x2f9   :  { %1846 = vmatmul.msk.f32.vlgmr.msrb.gmra.mxu0 %vm78_vm1, %v175_v42 }
 0x300   :  { %v229_v43 = vpop.f32.mrf.mxu1 }
 0x301   :  { %v260_v44 = vsel %vm78_vm1, %v229_v43, -inf }
 0x302   :  { %261 = vmax.xlane.f32.xlu0 %v260_v44 }
 0x316   :  { %178 = vrot.lane.b32.xlu0 %v2131_v12, %s2033_s11 }
 0x31e   :  { %402 = vrot.lane.b32.xlu0 %v2125_v10, %s2040_s17 }
 0x348   :  { %264 = vmax.xlane.f32.xlu0 %v263_v46 }
 0x35c   :  { %428 = vrot.lane.b32.xlu0 %v2131_v12, %s2037_s14 }
 0x375   :  { %v262_v47 = vpop.xlane.xlu0 %261 }
 0x376   :  { %v266_v48 = vsub.f32 %v229_v43, %v262_v47  ;;  %v2203_v22 = vpop.f32.mrf.mxu0 }
 0x378   :  { %v268_v49 = vmul.f32 1.442695, %v266_v48 }
 0x37a   :  { %1955 = vpow2.f32 %v268_v49 }
 0x37b   :  { %1957 = vrcp.f32 %v147_v50 }
 0x380   :  { %v1956_v51 = vpop.eup %1955 }
 0x381   :  { %v272_v52 = vsel %vm78_vm1, %v1956_v51, 0.0  ;;  %v1958_v53 = vpop.eup %1957 }
 0x382   :  { %273 = vadd.xlane.f32.xlu1 %v272_v52  ;;  %v151_v55 = vmul.f32 %v1958_v53, %v1952_v33 }
 0x388   :  { %v179_v54 = vpop.permute.xlu0 %178 }
 0x389   :  { %199 = vmatpush.msra.mxu3 %v179_v54 }
 0x38a   :  { %1837 = vmatmul.msk.f32.vlgmr.msra.gmra.mxu3 %vm78_vm1, %v151_v55 }
 0x390   :  { %v403_v56 = vpop.permute.xlu0 %402 }
 0x39b   :  { %282 = vrot.lane.b32.xlu1 %v2125_v10, %s2038_s15 }
 0x3bb   :  { %v265_v57 = vpop.xlane.xlu0 %264 }
 0x3bc   :  { %v267_v58 = vsub.f32 %v257_v45, %v265_v57 }
 0x3be   :  { %v270_v59 = vmul.f32 1.442695, %v267_v58 }
 0x3c0   :  { %1959 = vpow2.f32 %v270_v59 }
 0x3c6   :  { %v1960_v60 = vpop.eup %1959 }
 0x3c7   :  { %v275_v61 = vsel %vm78_vm1, %v1960_v60, 0.0 }
 0x3c8   :  { %276 = vadd.xlane.f32.xlu1 %v275_v61 }
 0x3ce   :  { %v429_v15 = vpop.permute.xlu0 %428 }
 0x3e1   :  { %565 = vrot.lane.b32.xlu1 %v2125_v10, %s2042_s19 }
 0x3e9   :  { %478 = vrot.lane.b32.xlu1 %v2125_v10, %s2043_s20 }
 0x3f1   :  { %595 = vrot.lane.b32.xlu1 %v2131_v12, %s2041_s18 }
 0x3f5   :  { %v274_v62 = vpop.xlane.xlu1 %273 }
 0x3f6   :  { %1961 = vrcp.f32 %v274_v62 }
 0x3f9   :  { %593 = vrot.lane.b32.xlu1 %v2131_v12, %s2042_s19 }
 0x3fc   :  { %v1962_v63 = vpop.eup %1961 }
 0x3fd   :  { %v280_v9 = vmul.f32 %v1962_v63, %v1956_v51 }
 0x40d   :  { %v201_v4 = vpop.f32.mrf.mxu3  ;;  %v283_v8 = vpop.permute.xlu1 %282 }
 0x40e   :  { %303 = vmatpush.msrb.mxu3 %v283_v8  ;;  %1847 = vmatmul.msk.f32.gmra.mxu0 %vm78_vm1, %v201_v4 }
 0x40f   :  { %1842 = vmatmul.msk.f32.vlgmr.msrb.gmra.mxu3 %vm78_vm1, %v280_v9 }
 0x410   :  { %1848 = vmatpush.xpose.msk.msra.mxu3 %vm78_vm1, %v403_v56 }
 0x417   :  { %1849 = vmatmul.msk.f32.vlgmr.msra.gmra.mxu3 %vm78_vm1, %v2164_v32 }
 0x43b   :  { %v277_v11 = vpop.xlane.xlu1 %276 }
 0x43c   :  { %1963 = vrcp.f32 %v277_v11 }
 0x442   :  { %v1964_v13 = vpop.eup %1963 }
 0x443   :  { %v281_v14 = vmul.f32 %v1964_v13, %v1960_v60 }
 0x445   :  { %1843 = vmatmul.msk.f32.vlgmr.msrb.gmra.mxu1 %vm78_vm1, %v281_v14 }
 0x44d   :  { %1851 = vmatmul.msk.f32.vlgmr.msra.gmra.mxu1 %vm78_vm1, %v429_v15 }
 0x453   :  { %v566_v16 = vpop.permute.xlu1 %565 }
 0x454   :  { %1857 = vmatmul.msk.f32.vlgmr.msra.gmra.mxu0 %vm78_vm1, %v566_v16 }
 0x45b   :  { %v479_v17 = vpop.permute.xlu1 %478 }
 0x45c   :  { %499 = vmatpush.msrb.mxu3 %v479_v17  ;;  %v732_v17 = vperm.slane %v2122_v7, 1 }
 0x463   :  { %v596_v18 = vpop.permute.xlu1 %595 }
 0x464   :  { %1858 = vmatpush.xpose.msk.msra.mxu3 %vm78_vm1, %v596_v18 }
 0x46b   :  { %v594_v34 = vpop.permute.xlu1 %593 }
 0x48b   :  { %v2205_v24 = vpop.f32.mrf.mxu0 }
 0x492   :  { %v305_v19 = vpop.f32.mrf.mxu3 }
 0x49a   :  { %v425_v20 = vpop.f32.mrf.mxu3 }
 0x49b   :  { %v456_v21 = vsel %vm78_vm1, %v425_v20, -inf }
 0x49c   :  { %457 = vmax.xlane.f32.xlu2 %v456_v21 }
 0x4c2   :  { %v331_v23 = vpop.f32.mrf.mxu1 }
 0x4ca   :  { %v453_v25 = vpop.f32.mrf.mxu1 }
 0x4cb   :  { %v459_v26 = vsel %vm78_vm1, %v453_v25, -inf }
 0x4cc   :  { %460 = vmax.xlane.f32.xlu2 %v459_v26 }
 0x4d1   :  { %v590_v27 = vpop.f32.mrf.mxu0 }
 0x4d2   :  { %v621_v28 = vsel %vm78_vm1, %v590_v27, -inf }
 0x4d3   :  { %622 = vmax.xlane.f32.xlu1 %v621_v28 }
 0x50f   :  { %v458_v29 = vpop.xlane.xlu2 %457 }
 0x510   :  { %v462_v30 = vsub.f32 %v425_v20, %v458_v29 }
 0x512   :  { %v464_v31 = vmul.f32 1.442695, %v462_v30 }
 0x514   :  { %1965 = vpow2.f32 %v464_v31 }
 0x51a   :  { %v1966_v32 = vpop.eup %1965 }
 0x51b   :  { %v468_v33 = vsel %vm78_vm1, %v1966_v32, 0.0 }
 0x51c   :  { %469 = vadd.xlane.f32.xlu0 %v468_v33 }
 0x53f   :  { %v461_v35 = vpop.xlane.xlu2 %460 }
 0x540   :  { %v463_v36 = vsub.f32 %v453_v25, %v461_v35 }
 0x542   :  { %v466_v37 = vmul.f32 1.442695, %v463_v36 }
 0x544   :  { %1967 = vpow2.f32 %v466_v37  ;;  %v34_v37 = vld [vmem:[%s2556_s1 + $0x38] sm:$0xff] }
 0x546   :  { %v623_v38 = vpop.xlane.xlu1 %622 }
 0x547   :  { %v627_v39 = vsub.f32 %v590_v27, %v623_v38  ;;  %v32_v38 = vld [vmem:[%s2556_s1 + $0x28] sm:$0xff] }
 0x549   :  { %v629_v40 = vmul.f32 1.442695, %v627_v39  ;;  %v30_v39 = vld [vmem:[%s2556_s1 + $0x18] sm:$0xff] }
 0x54a   :  { %v1968_v41 = vpop.eup %1967 }
 0x54b   :  { %1969 = vpow2.f32 %v629_v40  ;;  %v471_v42 = vsel %vm78_vm1, %v1968_v41, 0.0  ;;  %v28_v40 = vld [vmem:[%s2556_s1 + $0x8] sm:$0xff] }
 0x54c   :  { %472 = vadd.xlane.f32.xlu2 %v471_v42 }
 0x551   :  { %v1970_v43 = vpop.eup %1969 }
 0x552   :  { %v633_v44 = vsel %vm78_vm1, %v1970_v43, 0.0 }
 0x553   :  { %634 = vadd.xlane.f32.xlu0 %v633_v44 }
 0x564   :  { %504 = vrot.lane.b32.xlu2 %v2131_v12, %s2043_s20 }
 0x567   :  { %643 = vrot.lane.b32.xlu0 %v2125_v10, %s2044_s21 }
 0x56c   :  { %335 = vrot.lane.b32.xlu2 %v2098_v3, %s2039_s16 }
 0x574   :  { %1938 = vrot.lane.b32.xlu2 %v1937_v2, %s2039_s16 }
 0x58f   :  { %v470_v45 = vpop.xlane.xlu0 %469 }
 0x590   :  { %1971 = vrcp.f32 %v470_v45 }
 0x596   :  { %v1972_v46 = vpop.eup %1971 }
 0x597   :  { %v476_v47 = vmul.f32 %v1972_v46, %v1966_v32 }
 0x599   :  { %1852 = vmatmul.msk.f32.vlgmr.msrb.gmra.mxu3 %vm78_vm1, %v476_v47 }
 0x5a1   :  { %1859 = vmatmul.msk.f32.vlgmr.msra.gmra.mxu3 %vm78_vm1, %v594_v34 }
 0x5bf   :  { %v473_v48 = vpop.xlane.xlu2 %472 }
 0x5c0   :  { %1973 = vrcp.f32 %v473_v48 }
 0x5c6   :  { %v1974_v49 = vpop.eup %1973  ;;  %v635_v3 = vpop.xlane.xlu0 %634 }
 0x5c7   :  { %v477_v10 = vmul.f32 %v1974_v49, %v1968_v41  ;;  %v505_v50 = vpop.permute.xlu2 %504  ;;  %1975 = vrcp.f32 %v635_v3 }
 0x5c8   :  { %525 = vmatpush.msrb.mxu1 %v505_v50 }
 0x5c9   :  { %1853 = vmatmul.msk.f32.vlgmr.msrb.gmra.mxu1 %vm78_vm1, %v477_v10  ;;  %v786_v10 = vperm.slane %v2122_v7, 2 }
 0x5cd   :  { %v1976_v0 = vpop.eup %1975 }
 0x5ce   :  { %v641_v53 = vmul.f32 %v1976_v0, %v1970_v43 }
 0x5cf   :  { %v336_v51 = vpop.permute.xlu2 %335 }
 0x5d0   :  { %359 = vmatpush.msra.mxu2 %v336_v51  ;;  %v789_v51 = vperm.slane %v2122_v7, 3 }
 0x5d1   :  { %1844 = vmatmul.msk.f32.vlgmr.msra.gmra.mxu2 %vm78_vm1, %v305_v19 }
 0x5d7   :  { %v1939_v1 = vpop.permute.xlu2 %1938 }
 0x5d8   :  { %v1941_v2 = vunpack.i.h.bf16 %v1939_v1  ;;  %v1940_v52 = vunpack.i.l.bf16 %v1939_v1 }
 0x5d9   :  { %1845 = vmatmul.msk.f32.gmra.mxu2 %vm78_vm1, %v331_v23  ;;  %v644_v54 = vpop.permute.xlu0 %643 }
 0x5da   :  { %664 = vmatpush.msra.mxu1 %v644_v54  ;;  %555 = vmatpush.msrb.mxu2 %v1940_v52  ;;  %v41_v52 = vld [vmem:[%s2559_s2 + $0x30] sm:$0xff]  ;;  %v39_v54 = vld [vmem:[%s2559_s2 + $0x20] sm:$0xff] }
 0x5db   :  { %1860 = vmatmul.msk.f32.vlgmr.msra.gmra.mxu1 %vm78_vm1, %v641_v53  ;;  %720 = vmatpush.msrb.mxu3 %v1941_v2  ;;  %v42_v2 = vld [vmem:[%s2559_s2 + $0x38] sm:$0xff]  ;;  %v40_v53 = vld [vmem:[%s2559_s2 + $0x28] sm:$0xff] }
 0x5dc   :  { %811 = vmatpush.msrb.mxu1 %v34_v37  ;;  %840 = vmatpush.msra.mxu2 %v42_v2 }
 0x5de   :  { %812 = vmatpush.msrb.mxu1 %v32_v38  ;;  %841 = vmatpush.msra.mxu2 %v41_v52 }
 0x5e0   :  { %813 = vmatpush.msrb.mxu1 %v30_v39  ;;  %842 = vmatpush.msra.mxu2 %v40_v53 }
 0x5e2   :  { %814 = vmatpush.msrb.mxu1 %v28_v40  ;;  %843 = vmatpush.msra.mxu2 %v39_v54  ;;  %v901_v54 = vperm.slane %v2122_v7, 6 }
 0x61c   :  { %v501_v55 = vpop.f32.mrf.mxu3 }
 0x61d   :  { %1854 = vmatmul.msk.f32.vlgmr.msrb.gmra.mxu2 %vm78_vm1, %v501_v55  ;;  %v38_v55 = vld [vmem:[%s2559_s2 + $0x18] sm:$0xff] }
 0x61e   :  { %844 = vmatpush.msra.mxu2 %v38_v55 }
 0x624   :  { %v618_v56 = vpop.f32.mrf.mxu3 }
 0x625   :  { %v624_v57 = vsel %vm78_vm1, %v618_v56, -inf }
 0x626   :  { %625 = vmax.xlane.f32.xlu0 %v624_v57 }
 0x646   :  { %v527_v58 = vpop.f32.mrf.mxu1 }
 0x647   :  { %1855 = vmatmul.msk.f32.gmra.mxu2 %vm78_vm1, %v527_v58 }
 0x654   :  { %v361_v8 = vpop.f32.mrf.mxu2 }
 0x655   :  { %v395_v13 = vadd.f32 %v2203_v22, %v361_v8  ;;  %v2045_v22 = vmov 32.0   ;;  %v792_v8 = vperm.slane %v2122_v7, 4 }
 0x658   :  { %v666_v59 = vpop.f32.mrf.mxu1 }
 0x659   :  { %1862 = vmatmul.msk.f32.vlgmr.msrb.gmra.mxu3 %vm78_vm1, %v666_v59 }
 0x65c   :  { %v2235_v9 = vpop.f32.mrf.mxu2 }
 0x65d   :  { %v398_v57 = vadd.f32 %v2205_v24, %v2235_v9  ;;  %v36_v24 = vld [vmem:[%s2559_s2 + $0x8] sm:$0xff] }
 0x699   :  { %v626_v60 = vpop.xlane.xlu0 %625 }
 0x69a   :  { %v628_v61 = vsub.f32 %v618_v56, %v626_v60 }
 0x69c   :  { %v631_v62 = vmul.f32 1.442695, %v628_v61 }
 0x69e   :  { %1977 = vpow2.f32 %v631_v62 }
 0x6a0   :  { %v557_v11 = vpop.f32.mrf.mxu2 }
 0x6a1   :  { %v563_v14 = vadd.f32 %v557_v11, %v395_v13 }
 0x6a4   :  { %v1978_v63 = vpop.eup %1977 }
 0x6a5   :  { %v636_v4 = vsel %vm78_vm1, %v1978_v63, 0.0 }
 0x6a6   :  { %637 = vadd.xlane.f32.xlu1 %v636_v4  ;;  %v37_v4 = vld [vmem:[%s2559_s2 + $0x10] sm:$0xff] }
 0x6a7   :  { %845 = vmatpush.msra.mxu2 %v37_v4  ;;  %v2355_v4 = vld [vmem:[%s2558_s3 + $0x8] sm:$0xff] }
 0x6a9   :  { %846 = vmatpush.msra.mxu2 %v36_v24  ;;  %v927_v24 = vperm.slane %v2355_v4, 0 }
 0x6bf   :  { %669 = vrot.lane.b32.xlu1 %v2131_v12, %s2044_s21 }
 0x6ca   :  { %v560_v56 = vpop.f32.mrf.mxu2 }
 0x6cb   :  { %v564_v58 = vadd.f32 %v560_v56, %v398_v57  ;;  %v904_v57 = vperm.slane %v2122_v7, 7 }
 0x6dc   :  { %v722_v15 = vpop.f32.mrf.mxu3 }
 0x6dd   :  { %v728_v16 = vadd.f32 %v722_v15, %v563_v14 }
 0x6df   :  { %v730_v18 = vadd.f32 %v728_v16, %v2108_v5 }
 0x6e1   :  { %v733_v19 = vadd.f32 %v732_v17, %v730_v18 }
 0x6e3   :  { %v735_v20 = vsel %vm45_vm0, %v733_v19, 0.0 }
 0x6e4   :  { %736 = vadd.xlane.f32.xlu2 %v735_v20 }
 0x719   :  { %v638_v12 = vpop.xlane.xlu1 %637 }
 0x71a   :  { %1979 = vrcp.f32 %v638_v12 }
 0x71b   :  { %1981 = vrcp.f32 %v2045_v22 }
 0x720   :  { %v1980_v21 = vpop.eup %1979 }
 0x721   :  { %v642_v23 = vmul.f32 %v1980_v21, %v1978_v63  ;;  %v1982_v26 = vpop.eup %1981 }
 0x722   :  { %v742_v27 = vmul.f32 32.0, %v1982_v26  ;;  %vm746_vm2 = vweird.f32 %v1982_v26 }
 0x724   :  { %v743_v28 = vsub.f32 1.0, %v742_v27 }
 0x726   :  { %v744_v5 = vmul.f32 %v1982_v26, %v743_v28 }
 0x728   :  { %v745_v29 = vadd.f32 %v1982_v26, %v744_v5 }
 0x72a   :  { %v2244_v30 = vsel %vm746_vm2, %v1982_v26, %v745_v29 }
 0x731   :  { %v670_v25 = vpop.permute.xlu1 %669 }
 0x732   :  { %690 = vmatpush.msrb.mxu0 %v670_v25 }
 0x733   :  { %1861 = vmatmul.msk.f32.vlgmr.msrb.gmra.mxu0 %vm78_vm1, %v642_v23 }
 0x757   :  { %v737_v31 = vpop.xlane.xlu2 %736 }
 0x758   :  { %v748_v32 = vmul.f32 %v2244_v30, %v737_v31 }
 0x75a   :  { %v750_v33 = vsub.f32 %v733_v19, %v748_v32  ;;  %v824_v19 = vperm.slane %v2122_v7, 5 }
 0x75c   :  { %v752_v34 = vmul.f32 %v750_v33, %v750_v33 }
 0x75e   :  { %v754_v35 = vsel %vm45_vm0, %v752_v34, 0.0 }
 0x75f   :  { %755 = vadd.xlane.f32.xlu1 %v754_v35 }
 0x7b0   :  { %v692_v36 = vpop.f32.mrf.mxu0 }
 0x7b1   :  { %1863 = vmatmul.msk.f32.gmra.mxu3 %vm78_vm1, %v692_v36 }
 0x7d2   :  { %v756_v41 = vpop.xlane.xlu1 %755 }
 0x7d3   :  { %v760_v42 = vmul.f32 %v756_v41, %v2244_v30 }
 0x7d5   :  { %v762_v43 = vadd.f32 1e-05, %v760_v42 }
 0x7d7   :  { %1983 = vrsqrt.f32 %v762_v43  ;;  %vm770_vm4 = vweird.f32 %v762_v43 }
 0x7dd   :  { %v1984_v44 = vpop.eup %1983 }
 0x7de   :  { %v765_v45 = vmul.f32 %v1984_v44, %v762_v43  ;;  %vm771_vm3 = vweird.f32 %v1984_v44 }
 0x7df   :  { %vm772_vm5 = vmor %vm770_vm4, %vm771_vm3 }
 0x7e0   :  { %v766_v46 = vmul.f32 %v1984_v44, %v765_v45  ;;  %v2319_v45 = vld [vmem:[%s2556_s1 + $0x70] sm:$0xff] }
 0x7e1   :  { %946 = vmatpush.msra.mxu0 %v2319_v45 }
 0x7e2   :  { %v767_v47 = vmul.f32 0.5, %v766_v46  ;;  %v2325_v46 = vld [vmem:[%s2556_s1 + $0x60] sm:$0xff] }
 0x7e3   :  { %947 = vmatpush.msra.mxu0 %v2325_v46 }
 0x7e4   :  { %v768_v48 = vsub.f32 1.5, %v767_v47  ;;  %v1942_v47 = vpack.i.bf16 %v2319_v45, %v2325_v46 }
 0x7e6   :  { %v769_v49 = vmul.f32 %v1984_v44, %v768_v48  ;;  %v2333_v48 = vld [vmem:[%s2556_s1 + $0x50] sm:$0xff] }
 0x7e7   :  { %948 = vmatpush.msra.mxu0 %v2333_v48 }
 0x7e8   :  { %v773_v50 = vsel %vm772_vm5, %v1984_v44, %v769_v49  ;;  %v2338_v49 = vld [vmem:[%s2556_s1 + $0x40] sm:$0xff] }
 0x7e9   :  { %v784_v3 = vmul.f32 %v773_v50, %v750_v33  ;;  %949 = vmatpush.msra.mxu0 %v2338_v49 }
 0x7eb   :  { %v787_v0 = vmul.f32 %v786_v10, %v784_v3 }
 0x7ed   :  { %v790_v1 = vadd.f32 %v789_v51, %v787_v0 }
 0x7ef   :  { %1864 = vmatmul.msk.f32.vlgmr.msrb.gmra.mxu1 %vm45_vm0, %v790_v1 }
 0x834   :  { %v725_v59 = vpop.f32.mrf.mxu3 }
 0x835   :  { %v729_v60 = vadd.f32 %v725_v59, %v564_v58 }
 0x837   :  { %v731_v61 = vadd.f32 %v729_v60, %v2115_v6  ;;  %v35_v6 = vld [vmem:[%s2559_s2] sm:$0xff] }
 0x838   :  { %847 = vmatpush.msra.mxu2 %v35_v6 }
 0x839   :  { %v734_v62 = vadd.f32 %v732_v17, %v731_v61 }
 0x83b   :  { %v738_v63 = vsel %vm45_vm0, %v734_v62, 0.0 }
 0x83c   :  { %739 = vadd.xlane.f32.xlu0 %v738_v63 }
 0x86c   :  { %v816_v9 = vpop.f32.mrf.mxu1 }
 0x86d   :  { %v817_v11 = vadd.f32 %v816_v9, %v792_v8 }
 0x86f   :  { %v822_v13 = vmax.f32 %v817_v11, 0.0 }
 0x871   :  { %1866 = vmatmul.msk.f32.vlgmr.msra.gmra.mxu2 %vm825_vm6, %v822_v13 }
 0x8af   :  { %v740_v14 = vpop.xlane.xlu0 %739 }
 0x8b0   :  { %v749_v15 = vmul.f32 %v2244_v30, %v740_v14 }
 0x8b2   :  { %v751_v16 = vsub.f32 %v734_v62, %v749_v15 }
 0x8b4   :  { %v753_v17 = vmul.f32 %v751_v16, %v751_v16 }
 0x8b6   :  { %v757_v18 = vsel %vm45_vm0, %v753_v17, 0.0 }
 0x8b7   :  { %758 = vadd.xlane.f32.xlu0 %v757_v18 }
 0x8f4   :  { %v849_v20 = vpop.f32.mrf.mxu2 }
 0x8f5   :  { %v850_v12 = vadd.f32 %v849_v20, %v824_v19 }
 0x8f7   :  { %v855_v21 = vadd.f32 %v850_v12, %v790_v1 }
 0x8f9   :  { %v857_v23 = vsel %vm45_vm0, %v855_v21, 0.0 }
 0x8fa   :  { %858 = vadd.xlane.f32.xlu2 %v857_v23 }
 0x92a   :  { %v759_v25 = vpop.xlane.xlu0 %758 }
 0x92b   :  { %v761_v22 = vmul.f32 %v759_v25, %v2244_v30 }
 0x92d   :  { %v763_v26 = vadd.f32 1e-05, %v761_v22 }
 0x92f   :  { %1985 = vrsqrt.f32 %v763_v26  ;;  %vm780_vm8 = vweird.f32 %v763_v26 }
 0x935   :  { %v1986_v27 = vpop.eup %1985 }
 0x936   :  { %v775_v28 = vmul.f32 %v1986_v27, %v763_v26  ;;  %vm781_vm7 = vweird.f32 %v1986_v27 }
 0x937   :  { %vm782_vm9 = vmor %vm780_vm8, %vm781_vm7 }
 0x938   :  { %v776_v5 = vmul.f32 %v1986_v27, %v775_v28 }
 0x93a   :  { %v777_v29 = vmul.f32 0.5, %v776_v5 }
 0x93c   :  { %v778_v31 = vsub.f32 1.5, %v777_v29 }
 0x93e   :  { %v779_v32 = vmul.f32 %v1986_v27, %v778_v31 }
 0x940   :  { %v783_v33 = vsel %vm782_vm9, %v1986_v27, %v779_v32 }
 0x941   :  { %v785_v34 = vmul.f32 %v783_v33, %v751_v16 }
 0x943   :  { %v788_v35 = vmul.f32 %v786_v10, %v785_v34 }
 0x945   :  { %v791_v36 = vadd.f32 %v789_v51, %v788_v35 }
 0x947   :  { %1865 = vmatmul.msk.f32.gmra.mxu1 %vm45_vm0, %v791_v36 }
 0x96d   :  { %v859_v37 = vpop.xlane.xlu2 %858 }
 0x96e   :  { %v863_v38 = vmul.f32 %v859_v37, %v2244_v30 }
 0x970   :  { %v865_v39 = vsub.f32 %v855_v21, %v863_v38 }
 0x972   :  { %v867_v40 = vmul.f32 %v865_v39, %v865_v39 }
 0x974   :  { %v869_v41 = vsel %vm45_vm0, %v867_v40, 0.0 }
 0x975   :  { %870 = vadd.xlane.f32.xlu0 %v869_v41 }
 0x9c4   :  { %v819_v42 = vpop.f32.mrf.mxu1 }
 0x9c5   :  { %v820_v43 = vadd.f32 %v819_v42, %v792_v8 }
 0x9c7   :  { %v823_v44 = vmax.f32 %v820_v43, 0.0 }
 0x9c9   :  { %1867 = vmatmul.msk.f32.gmra.mxu2 %vm825_vm6, %v823_v44 }
 0x9e8   :  { %v871_v10 = vpop.xlane.xlu0 %870 }
 0x9e9   :  { %v875_v50 = vmul.f32 %v871_v10, %v2244_v30 }
 0x9eb   :  { %v877_v3 = vadd.f32 1e-05, %v875_v50 }
 0x9ed   :  { %1987 = vrsqrt.f32 %v877_v3  ;;  %vm885_vm11 = vweird.f32 %v877_v3 }
 0x9f3   :  { %v1988_v51 = vpop.eup %1987 }
 0x9f4   :  { %v880_v0 = vmul.f32 %v1988_v51, %v877_v3  ;;  %vm886_vm10 = vweird.f32 %v1988_v51 }
 0x9f5   :  { %vm887_vm12 = vmor %vm885_vm11, %vm886_vm10 }
 0x9f6   :  { %v881_v1 = vmul.f32 %v1988_v51, %v880_v0 }
 0x9f8   :  { %v882_v2 = vmul.f32 0.5, %v881_v1 }
 0x9fa   :  { %v883_v52 = vsub.f32 1.5, %v882_v2 }
 0x9fc   :  { %v884_v53 = vmul.f32 %v1988_v51, %v883_v52 }
 0x9fe   :  { %v888_v55 = vsel %vm887_vm12, %v1988_v51, %v884_v53 }
 0x9ff   :  { %v899_v56 = vmul.f32 %v888_v55, %v865_v39 }
 0xa01   :  { %v902_v58 = vmul.f32 %v901_v54, %v899_v56 }
 0xa03   :  { %v2345_v59 = vadd.f32 %v904_v57, %v902_v58 }
 0xa05   :  { %1885 = vmatmul.msk.f32.vlgmr.msra.gmra.mxu0 %vm45_vm0, %v2345_v59 }
 0xa4c   :  { %v852_v60 = vpop.f32.mrf.mxu2 }
 0xa4d   :  { %v853_v61 = vadd.f32 %v852_v60, %v824_v19 }
 0xa4f   :  { %v856_v62 = vadd.f32 %v853_v61, %v791_v36 }
 0xa51   :  { %v860_v63 = vsel %vm45_vm0, %v856_v62, 0.0 }
 0xa52   :  { %861 = vadd.xlane.f32.xlu2 %v860_v63 }
 0xa82   :  { %v951_v6 = vpop.f32.mrf.mxu0 }
 0xa83   :  { %v2358_v8 = vadd.f32 %v951_v6, %v927_v24 }
 0xa85   :  { %1085 = vrot.lane.b32.xlu1 %v2358_v8, %s2036_s13  ;;  %958 = vrot.lane.b32.xlu2 %v2358_v8, %s2034_s12 }
 0xac5   :  { %v862_v7 = vpop.xlane.xlu2 %861 }
 0xac6   :  { %v864_v9 = vmul.f32 %v862_v7, %v2244_v30 }
 0xac8   :  { %v866_v11 = vsub.f32 %v856_v62, %v864_v9 }
 0xaca   :  { %v868_v13 = vmul.f32 %v866_v11, %v866_v11 }
 0xacc   :  { %v872_v14 = vsel %vm45_vm0, %v868_v13, 0.0 }
 0xacd   :  { %873 = vadd.xlane.f32.xlu0 %v872_v14 }
 0xadf   :  { %v959_v15 = vpop.permute.xlu2 %958 }
 0xae0   :  { %1887 = vmatpush.xpose.msk.msra.mxu3 %vm78_vm1, %v959_v15 }
 0xae1   :  { %1087 = vrot.lane.b32.xlu0 %v2358_v8, %s2035_s0 }
 0xae3   :  { %1888 = vmatmul.msk.f32.vlgmr.msra.gmra.mxu3 %vm78_vm1, %v2358_v8 }
 0xaf7   :  { %v1086_v26 = vpop.permute.xlu1 %1085 }
 0xb40   :  { %v874_v16 = vpop.xlane.xlu0 %873 }
 0xb41   :  { %v876_v17 = vmul.f32 %v874_v16, %v2244_v30 }
 0xb43   :  { %v878_v18 = vadd.f32 1e-05, %v876_v17 }
 0xb45   :  { %1989 = vrsqrt.f32 %v878_v18  ;;  %vm895_vm14 = vweird.f32 %v878_v18 }
 0xb4b   :  { %v1990_v19 = vpop.eup %1989 }
 0xb4c   :  { %v890_v20 = vmul.f32 %v1990_v19, %v878_v18  ;;  %vm896_vm13 = vweird.f32 %v1990_v19 }
 0xb4d   :  { %vm897_vm15 = vmor %vm895_vm14, %vm896_vm13  ;;  %vm1815_vm14 = vcmask 254976  }
 0xb4e   :  { %v891_v12 = vmul.f32 %v1990_v19, %v890_v20 }
 0xb50   :  { %v892_v21 = vmul.f32 0.5, %v891_v12 }
 0xb52   :  { %v893_v23 = vsub.f32 1.5, %v892_v21 }
 0xb53   :  { %v1088_v25 = vpop.permute.xlu0 %1087 }
 0xb54   :  { %v894_v22 = vmul.f32 %v1990_v19, %v893_v23  ;;  %1893 = vmatpush.xpose.msk.msrb.mxu3 %vm78_vm1, %v1088_v25 }
 0xb56   :  { %v898_v27 = vsel %vm897_vm15, %v1990_v19, %v894_v22  ;;  %vm1824_vm15 = vcmask 1024  }
 0xb57   :  { %1894 = vmatmul.msk.f32.vlgmr.msrb.gmra.mxu3 %vm78_vm1, %v1086_v26  ;;  %v900_v28 = vmul.f32 %v898_v27, %v866_v11 }
 0xb59   :  { %v903_v5 = vmul.f32 %v901_v54, %v900_v28 }
 0xb5b   :  { %v2374_v29 = vadd.f32 %v904_v57, %v903_v5 }
 0xb5d   :  { %1886 = vmatmul.msk.f32.gmra.mxu0 %vm45_vm0, %v2374_v29 }
 0xb66   :  { %v981_v31 = vpop.f32.mrf.mxu3 }
 0xb67   :  { %v1011_v32 = vsel %vm78_vm1, %v981_v31, -inf }
 0xb68   :  { %1012 = vmax.xlane.f32.xlu2 %v1011_v32 }
 0xb80   :  { %1163 = vrot.lane.b32.xlu2 %v2358_v8, %s2038_s15 }
 0xbda   :  { %v954_v33 = vpop.f32.mrf.mxu0  ;;  %v1110_v40 = vpop.f32.mrf.mxu3 }
 0xbdb   :  { %v2381_v34 = vadd.f32 %v954_v33, %v927_v24  ;;  %v1013_v35 = vpop.xlane.xlu2 %1012  ;;  %v1141_v41 = vsel %vm78_vm1, %v1110_v40, -inf }
 0xbdc   :  { %v1017_v36 = vsub.f32 %v981_v31, %v1013_v35 }
 0xbdd   :  { %985 = vrot.lane.b32.xlu0 %v2381_v34, %s2034_s12 }
 0xbde   :  { %v1019_v37 = vmul.f32 1.442695, %v1017_v36 }
 0xbe0   :  { %1991 = vpow2.f32 %v1019_v37 }
 0xbe3   :  { %v1164_v53 = vpop.permute.xlu2 %1163 }
 0xbe6   :  { %v1992_v38 = vpop.eup %1991 }
 0xbe7   :  { %v1023_v39 = vsel %vm78_vm1, %v1992_v38, 0.0 }
 0xbe8   :  { %1024 = vadd.xlane.f32.xlu1 %v1023_v39 }
 0xc01   :  { %1115 = vrot.lane.b32.xlu1 %v2381_v34, %s2035_s0 }
 0xc07   :  { %1142 = vmax.xlane.f32.xlu0 %v1141_v41 }
 0xc1b   :  { %1033 = vrot.lane.b32.xlu0 %v2358_v8, %s2033_s11 }
 0xc23   :  { %1113 = vrot.lane.b32.xlu0 %v2381_v34, %s2036_s13 }
 0xc2b   :  { %1281 = vrot.lane.b32.xlu0 %v2358_v8, %s2037_s14 }
 0xc33   :  { %1059 = vrot.lane.b32.xlu0 %v2381_v34, %s2033_s11 }
 0xc4f   :  { %v986_v42 = vpop.permute.xlu0 %985 }
 0xc50   :  { %1889 = vmatpush.xpose.msk.msra.mxu1 %vm78_vm1, %v986_v42 }
 0xc53   :  { %1890 = vmatmul.msk.f32.vlgmr.msra.gmra.mxu1 %vm78_vm1, %v2381_v34 }
 0xc5b   :  { %v1025_v43 = vpop.xlane.xlu1 %1024 }
 0xc73   :  { %v1116_v44 = vpop.permute.xlu1 %1115 }
 0xc74   :  { %1895 = vmatpush.xpose.msk.msrb.mxu1 %vm78_vm1, %v1116_v44 }
 0xc7a   :  { %v1143_v10 = vpop.xlane.xlu0 %1142 }
 0xc7b   :  { %v1147_v50 = vsub.f32 %v1110_v40, %v1143_v10 }
 0xc7d   :  { %v1149_v3 = vmul.f32 1.442695, %v1147_v50 }
 0xc7f   :  { %1993 = vpow2.f32 %v1149_v3 }
 0xc80   :  { %1995 = vrcp.f32 %v1025_v43 }
 0xc85   :  { %v1994_v51 = vpop.eup %1993 }
 0xc86   :  { %v1153_v0 = vsel %vm78_vm1, %v1994_v51, 0.0  ;;  %v1996_v1 = vpop.eup %1995 }
 0xc87   :  { %1154 = vadd.xlane.f32.xlu2 %v1153_v0  ;;  %v1031_v2 = vmul.f32 %v1996_v1, %v1992_v38 }
 0xc8d   :  { %v1034_v52 = vpop.permute.xlu0 %1033 }
 0xc8e   :  { %1054 = vmatpush.msrb.mxu2 %v1034_v52 }
 0xc8f   :  { %1891 = vmatmul.msk.f32.vlgmr.msrb.gmra.mxu2 %vm78_vm1, %v1031_v2 }
 0xc90   :  { %1184 = vmatpush.msra.mxu2 %v1164_v53 }
 0xc95   :  { %v1114_v54 = vpop.permute.xlu0 %1113 }
 0xc96   :  { %1896 = vmatmul.msk.f32.vlgmr.msrb.gmra.mxu1 %vm78_vm1, %v1114_v54 }
 0xc9d   :  { %v1282_v55 = vpop.permute.xlu0 %1281 }
 0xc9f   :  { %1283 = vrot.lane.b32.xlu2 %v2358_v8, %s2040_s17 }
 0xca5   :  { %v1060_v56 = vpop.permute.xlu0 %1059 }
 0xca6   :  { %1080 = vmatpush.msrb.mxu0 %v1060_v56 }
 0xcd0   :  { %v1008_v57 = vpop.f32.mrf.mxu1 }
 0xcd1   :  { %v1014_v58 = vsel %vm78_vm1, %v1008_v57, -inf }
 0xcd2   :  { %1015 = vmax.xlane.f32.xlu1 %v1014_v58 }
 0xcfa   :  { %v1155_v60 = vpop.xlane.xlu2 %1154 }
 0xcfb   :  { %1997 = vrcp.f32 %v1155_v60 }
 0xd01   :  { %v1998_v61 = vpop.eup %1997 }
 0xd02   :  { %v1161_v62 = vmul.f32 %v1998_v61, %v1994_v51  ;;  %v1284_v63 = vpop.permute.xlu2 %1283 }
 0xd03   :  { %1903 = vmatpush.xpose.msk.msrb.mxu2 %vm78_vm1, %v1284_v63 }
 0xd04   :  { %1897 = vmatmul.msk.f32.vlgmr.msra.gmra.mxu2 %vm78_vm1, %v1161_v62 }
 0xd0c   :  { %1904 = vmatmul.msk.f32.vlgmr.msrb.gmra.mxu2 %vm78_vm1, %v1282_v55 }
 0xd12   :  { %v1056_v15 = vpop.f32.mrf.mxu2 }
 0xd13   :  { %v1138_v24 = vpop.f32.mrf.mxu1 }
 0xd14   :  { %v1144_v6 = vsel %vm78_vm1, %v1138_v24, -inf }
 0xd15   :  { %1145 = vmax.xlane.f32.xlu0 %v1144_v6 }
 0xd29   :  { %1311 = vrot.lane.b32.xlu0 %v2381_v34, %s2040_s17 }
 0xd45   :  { %v1016_v7 = vpop.xlane.xlu1 %1015 }
 0xd46   :  { %v1018_v9 = vsub.f32 %v1008_v57, %v1016_v7 }
 0xd48   :  { %v1021_v11 = vmul.f32 1.442695, %v1018_v9 }
 0xd4a   :  { %1999 = vpow2.f32 %v1021_v11 }
 0xd50   :  { %v2000_v13 = vpop.eup %1999 }
 0xd51   :  { %v1026_v14 = vsel %vm78_vm1, %v2000_v13, 0.0 }
 0xd52   :  { %1027 = vadd.xlane.f32.xlu2 %v1026_v14 }
 0xd6a   :  { %1249 = vrot.lane.b32.xlu2 %v2338_v49, %s2039_s16 }
 0xd72   :  { %1359 = vrot.lane.b32.xlu2 %v2358_v8, %s2043_s20 }
 0xd87   :  { %v2418_v16 = vpop.f32.mrf.mxu2 }
 0xd88   :  { %v1146_v17 = vpop.xlane.xlu0 %1145 }
 0xd89   :  { %v1148_v18 = vsub.f32 %v1138_v24, %v1146_v17 }
 0xd8b   :  { %v1151_v19 = vmul.f32 1.442695, %v1148_v18 }
 0xd8d   :  { %2001 = vpow2.f32 %v1151_v19 }
 0xd8f   :  { %v1306_v20 = vpop.f32.mrf.mxu2 }
 0xd90   :  { %v1337_v12 = vsel %vm78_vm1, %v1306_v20, -inf }
 0xd91   :  { %1338 = vmax.xlane.f32.xlu1 %v1337_v12 }
 0xd93   :  { %v2002_v21 = vpop.eup %2001 }
 0xd94   :  { %v1156_v23 = vsel %vm78_vm1, %v2002_v21, 0.0 }
 0xd9b   :  { %1157 = vadd.xlane.f32.xlu2 %v1156_v23  ;;  %v1312_v39 = vpop.permute.xlu0 %1311 }
 0xdaa   :  { %1189 = vrot.lane.b32.xlu1 %v2381_v34, %s2038_s15 }
 0xdb2   :  { %1309 = vrot.lane.b32.xlu1 %v2381_v34, %s2037_s14 }
 0xdb3   :  { %1446 = vrot.lane.b32.xlu2 %v2358_v8, %s2042_s19 }
 0xdba   :  { %1448 = vrot.lane.b32.xlu1 %v2358_v8, %s2041_s18 }
 0xdc2   :  { %1474 = vrot.lane.b32.xlu1 %v2381_v34, %s2042_s19 }
 0xdc5   :  { %v1028_v49 = vpop.xlane.xlu2 %1027 }
 0xdc6   :  { %2003 = vrcp.f32 %v1028_v49 }
 0xdcc   :  { %v2004_v25 = vpop.eup %2003 }
 0xdcd   :  { %v1032_v22 = vmul.f32 %v2004_v25, %v2000_v13  ;;  %v1250_v26 = vpop.permute.xlu2 %1249 }
 0xdce   :  { %1273 = vmatpush.msra.mxu1 %v1250_v26 }
 0xdcf   :  { %1892 = vmatmul.msk.f32.vlgmr.msrb.gmra.mxu0 %vm78_vm1, %v1032_v22  ;;  %1901 = vmatmul.msk.f32.vlgmr.msra.gmra.mxu1 %vm78_vm1, %v1056_v15 }
 0xdd5   :  { %v1360_v27 = vpop.permute.xlu2 %1359 }
 0xdd6   :  { %1380 = vmatpush.msra.mxu2 %v1360_v27 }
 0xe04   :  { %v1339_v28 = vpop.xlane.xlu1 %1338 }
 0xe05   :  { %v1343_v5 = vsub.f32 %v1306_v20, %v1339_v28 }
 0xe07   :  { %v1345_v31 = vmul.f32 1.442695, %v1343_v5 }
 0xe09   :  { %2005 = vpow2.f32 %v1345_v31 }
 0xe0e   :  { %v1158_v33 = vpop.xlane.xlu2 %1157 }
 0xe0f   :  { %v2006_v32 = vpop.eup %2005  ;;  %2007 = vrcp.f32 %v1158_v33 }
 0xe10   :  { %v1349_v35 = vsel %vm78_vm1, %v2006_v32, 0.0 }
 0xe11   :  { %1350 = vadd.xlane.f32.xlu0 %v1349_v35 }
 0xe15   :  { %v2008_v36 = vpop.eup %2007 }
 0xe16   :  { %v1162_v37 = vmul.f32 %v2008_v36, %v2002_v21  ;;  %v1447_v43 = vpop.permute.xlu2 %1446 }
 0xe1c   :  { %v1190_v38 = vpop.permute.xlu1 %1189 }
 0xe1d   :  { %1210 = vmatpush.msra.mxu0 %v1190_v38 }
 0xe1e   :  { %1898 = vmatmul.msk.f32.vlgmr.msra.gmra.mxu0 %vm78_vm1, %v1162_v37 }
 0xe1f   :  { %1905 = vmatpush.xpose.msk.msrb.mxu0 %vm78_vm1, %v1312_v39 }
 0xe24   :  { %v1310_v40 = vpop.permute.xlu1 %1309 }
 0xe25   :  { %1476 = vrot.lane.b32.xlu0 %v2381_v34, %s2041_s18 }
 0xe26   :  { %1906 = vmatmul.msk.f32.vlgmr.msrb.gmra.mxu0 %vm78_vm1, %v1310_v40  ;;  %v1613_v40 = vperm.slane %v2355_v4, 1 }
 0xe2c   :  { %v1449_v41 = vpop.permute.xlu1 %1448 }
 0xe2d   :  { %1911 = vmatpush.xpose.msk.msrb.mxu1 %vm78_vm1, %v1449_v41 }
 0xe34   :  { %v1475_v51 = vpop.permute.xlu1 %1474 }
 0xe4c   :  { %v1082_v42 = vpop.f32.mrf.mxu0  ;;  %v2447_v52 = vpop.f32.mrf.mxu1 }
 0xe4d   :  { %1902 = vmatmul.msk.f32.gmra.mxu1 %vm78_vm1, %v1082_v42 }
 0xe55   :  { %1912 = vmatmul.msk.f32.vlgmr.msrb.gmra.mxu1 %vm78_vm1, %v1447_v43 }
 0xe84   :  { %v1351_v44 = vpop.xlane.xlu0 %1350 }
 0xe85   :  { %2009 = vrcp.f32 %v1351_v44 }
 0xe8b   :  { %v2010_v10 = vpop.eup %2009 }
 0xe8c   :  { %v1357_v50 = vmul.f32 %v2010_v10, %v2006_v32 }
 0xe8e   :  { %1907 = vmatmul.msk.f32.vlgmr.msra.gmra.mxu2 %vm78_vm1, %v1357_v50 }
 0xe97   :  { %v1477_v3 = vpop.permute.xlu0 %1476 }
 0xe98   :  { %1913 = vmatpush.xpose.msk.msrb.mxu2 %vm78_vm1, %v1477_v3 }
 0xe9b   :  { %v1212_v0 = vpop.f32.mrf.mxu0  ;;  %1914 = vmatmul.msk.f32.vlgmr.msrb.gmra.mxu2 %vm78_vm1, %v1475_v51 }
 0xea3   :  { %v1334_v1 = vpop.f32.mrf.mxu0 }
 0xea4   :  { %v1340_v2 = vsel %vm78_vm1, %v1334_v1, -inf }
 0xea5   :  { %1341 = vmax.xlane.f32.xlu0 %v1340_v2 }
 0xeca   :  { %v2449_v53 = vpop.f32.mrf.mxu1 }
 0xed2   :  { %v1471_v54 = vpop.f32.mrf.mxu1 }
 0xed3   :  { %v1502_v55 = vsel %vm78_vm1, %v1471_v54, -inf }
 0xed4   :  { %1503 = vmax.xlane.f32.xlu2 %v1502_v55 }
 0xf11   :  { %v1382_v56 = vpop.f32.mrf.mxu2 }
 0xf18   :  { %v1342_v57 = vpop.xlane.xlu0 %1341 }
 0xf19   :  { %v1344_v58 = vsub.f32 %v1334_v1, %v1342_v57 }
 0xf1b   :  { %v1347_v60 = vmul.f32 1.442695, %v1344_v58 }
 0xf1d   :  { %2011 = vpow2.f32 %v1347_v60 }
 0xf1e   :  { %v1499_v61 = vpop.f32.mrf.mxu2 }
 0xf1f   :  { %v1505_v62 = vsel %vm78_vm1, %v1499_v61, -inf }
 0xf20   :  { %1506 = vmax.xlane.f32.xlu1 %v1505_v62  ;;  %v1873_v62 = vld [vmem:[%s2556_s1 + $0x68] sm:$0xff] }
 0xf23   :  { %v2012_v63 = vpop.eup %2011 }
 0xf24   :  { %v1352_v24 = vsel %vm78_vm1, %v2012_v63, 0.0 }
 0xf25   :  { %1353 = vadd.xlane.f32.xlu0 %v1352_v24  ;;  %v1869_v24 = vld [vmem:[%s2556_s1 + $0x48] sm:$0xff] }
 0xf39   :  { %1385 = vrot.lane.b32.xlu1 %v2381_v34, %s2043_s20 }
 0xf41   :  { %1216 = vrot.lane.b32.xlu1 %v2333_v48, %s2039_s16 }
 0xf47   :  { %v1504_v6 = vpop.xlane.xlu2 %1503 }
 0xf48   :  { %v1508_v7 = vsub.f32 %v1471_v54, %v1504_v6 }
 0xf4a   :  { %v1510_v9 = vmul.f32 1.442695, %v1508_v7 }
 0xf4c   :  { %2013 = vpow2.f32 %v1510_v9 }
 0xf52   :  { %v2014_v11 = vpop.eup %2013 }
 0xf53   :  { %v1514_v13 = vsel %vm78_vm1, %v2014_v11, 0.0 }
 0xf54   :  { %1515 = vadd.xlane.f32.xlu2 %v1514_v13 }
 0xf6c   :  { %1524 = vrot.lane.b32.xlu2 %v2358_v8, %s2044_s21 }
 0xf74   :  { %1943 = vrot.lane.b32.xlu2 %v1942_v47, %s2039_s16 }
 0xf93   :  { %v1507_v14 = vpop.xlane.xlu1 %1506 }
 0xf94   :  { %v1509_v15 = vsub.f32 %v1499_v61, %v1507_v14 }
 0xf96   :  { %v1512_v17 = vmul.f32 1.442695, %v1509_v15 }
 0xf98   :  { %2015 = vpow2.f32 %v1512_v17  ;;  %v1354_v18 = vpop.xlane.xlu0 %1353 }
 0xf99   :  { %2017 = vrcp.f32 %v1354_v18  ;;  %v1660_v18 = vperm.slane %v2355_v4, 2 }
 0xf9e   :  { %v2016_v48 = vpop.eup %2015 }
 0xf9f   :  { %v1517_v19 = vsel %vm78_vm1, %v2016_v48, 0.0  ;;  %v2018_v20 = vpop.eup %2017 }
 0xfa0   :  { %1518 = vadd.xlane.f32.xlu0 %v1517_v19  ;;  %v1358_v12 = vmul.f32 %v2018_v20, %v2012_v63  ;;  %v1871_v63 = vld [vmem:[%s2556_s1 + $0x58] sm:$0xff] }
 0xfab   :  { %v1386_v21 = vpop.permute.xlu1 %1385 }
 0xfac   :  { %1406 = vmatpush.msra.mxu0 %v1386_v21 }
 0xfad   :  { %1908 = vmatmul.msk.f32.vlgmr.msra.gmra.mxu0 %vm78_vm1, %v1358_v12  ;;  %v1663_v12 = vperm.slane %v2355_v4, 3 }
 0xfb3   :  { %v1217_v8 = vpop.permute.xlu1 %1216 }
 0xfb4   :  { %1240 = vmatpush.msra.mxu3 %v1217_v8  ;;  %1550 = vrot.lane.b32.xlu0 %v2381_v34, %s2044_s21 }
 0xfb5   :  { %1899 = vmatmul.msk.f32.vlgmr.msra.gmra.mxu3 %vm78_vm1, %v2418_v16 }
 0xfbd   :  { %1900 = vmatmul.msk.f32.gmra.mxu3 %vm78_vm1, %v1212_v0 }
 0xfc7   :  { %v1516_v45 = vpop.xlane.xlu2 %1515 }
 0xfc8   :  { %2019 = vrcp.f32 %v1516_v45  ;;  %v1883_v45 = vld [vmem:[%s2559_s2 + $0x78] sm:$0xff] }
 0xfce   :  { %v2020_v46 = vpop.eup %2019 }
 0xfcf   :  { %v1522_v47 = vmul.f32 %v2020_v46, %v2014_v11  ;;  %v1525_v23 = vpop.permute.xlu2 %1524  ;;  %v1882_v46 = vld [vmem:[%s2559_s2 + $0x70] sm:$0xff] }
 0xfd0   :  { %1545 = vmatpush.msrb.mxu0 %v1525_v23 }
 0xfd1   :  { %1915 = vmatmul.msk.f32.vlgmr.msrb.gmra.mxu0 %vm78_vm1, %v1522_v47  ;;  %v1881_v47 = vld [vmem:[%s2559_s2 + $0x68] sm:$0xff] }
 0xfd7   :  { %v1944_v49 = vpop.permute.xlu2 %1943 }
 0xfd8   :  { %v1946_v25 = vunpack.i.h.bf16 %v1944_v49  ;;  %v1945_v22 = vunpack.i.l.bf16 %v1944_v49 }
 0xfda   :  { %1436 = vmatpush.msrb.mxu3 %v1945_v22  ;;  %1601 = vmatpush.msra.mxu2 %v1946_v25  ;;  %v1880_v25 = vld [vmem:[%s2559_s2 + $0x60] sm:$0xff] }
 0xfdb   :  { %1909 = vmatmul.msk.f32.vlgmr.msrb.gmra.mxu3 %vm78_vm1, %v1382_v56 }
 0xfdc   :  { %1713 = vmatpush.msra.mxu3 %v1883_v45  ;;  %v1777_v45 = vperm.slane %v2355_v4, 7 }
 0xfde   :  { %1714 = vmatpush.msra.mxu3 %v1882_v46 }
 0xfe0   :  { %1715 = vmatpush.msra.mxu3 %v1881_v47 }
 0xfe2   :  { %1716 = vmatpush.msra.mxu3 %v1880_v25 }
0x1013   :  { %v1519_v34 = vpop.xlane.xlu0 %1518 }
0x1014   :  { %2021 = vrcp.f32 %v1519_v34  ;;  %v1879_v34 = vld [vmem:[%s2559_s2 + $0x58] sm:$0xff] }
0x1015   :  { %1717 = vmatpush.msra.mxu3 %v1879_v34 }
0x101a   :  { %v2022_v16 = vpop.eup %2021 }
0x101b   :  { %v1523_v26 = vmul.f32 %v2022_v16, %v2016_v48 }
0x1026   :  { %v1551_v27 = vpop.permute.xlu0 %1550 }
0x1027   :  { %1571 = vmatpush.msra.mxu1 %v1551_v27 }
0x1028   :  { %1916 = vmatmul.msk.f32.vlgmr.msra.gmra.mxu1 %vm78_vm1, %v1523_v26 }
0x102a   :  { %v1408_v28 = vpop.f32.mrf.mxu0 }
0x102b   :  { %1910 = vmatmul.msk.f32.gmra.mxu3 %vm78_vm1, %v1408_v28 }
0x1038   :  { %v1242_v32 = vpop.f32.mrf.mxu3 }
0x1039   :  { %v1276_v36 = vadd.f32 %v2447_v52, %v1242_v32 }
0x1040   :  { %v1245_v33 = vpop.f32.mrf.mxu3 }
0x1041   :  { %v1279_v10 = vadd.f32 %v2449_v53, %v1245_v33 }
0x104e   :  { %v1547_v5 = vpop.f32.mrf.mxu0 }
0x104f   :  { %1917 = vmatmul.msk.f32.vlgmr.msra.gmra.mxu2 %vm78_vm1, %v1547_v5 }
0x105e   :  { %v1438_v35 = vpop.f32.mrf.mxu3 }
0x105f   :  { %v1444_v37 = vadd.f32 %v1438_v35, %v1276_v36 }
0x10a5   :  { %v1573_v31 = vpop.f32.mrf.mxu1 }
0x10a6   :  { %1918 = vmatmul.msk.f32.gmra.mxu2 %vm78_vm1, %v1573_v31 }
0x10ae   :  { %v1441_v44 = vpop.f32.mrf.mxu3 }
0x10af   :  { %v1445_v50 = vadd.f32 %v1441_v44, %v1279_v10 }
0x10d2   :  { %v1603_v38 = vpop.f32.mrf.mxu2 }
0x10d3   :  { %v1609_v39 = vadd.f32 %v1603_v38, %v1444_v37  ;;  %v1878_v37 = vld [vmem:[%s2559_s2 + $0x50] sm:$0xff]  ;;  %v1877_v38 = vld [vmem:[%s2559_s2 + $0x48] sm:$0xff] }
0x10d4   :  { %1718 = vmatpush.msra.mxu3 %v1878_v37 }
0x10d5   :  { %v1611_v41 = vadd.f32 %v1609_v39, %v2345_v59  ;;  %v1876_v39 = vld [vmem:[%s2559_s2 + $0x40] sm:$0xff] }
0x10d6   :  { %1719 = vmatpush.msra.mxu3 %v1877_v38 }
0x10d7   :  { %v1614_v42 = vadd.f32 %v1613_v40, %v1611_v41 }
0x10d8   :  { %1720 = vmatpush.msra.mxu3 %v1876_v39 }
0x10d9   :  { %v1616_v43 = vsel %vm45_vm0, %v1614_v42, 0.0 }
0x10da   :  { %1617 = vadd.xlane.f32.xlu0 %v1616_v43 }
0x1129   :  { %v1606_v3 = vpop.f32.mrf.mxu2 }
0x112a   :  { %v1610_v51 = vadd.f32 %v1606_v3, %v1445_v50  ;;  %v1698_v3 = vperm.slane %v2355_v4, 5 }
0x112c   :  { %v1612_v0 = vadd.f32 %v1610_v51, %v2374_v29  ;;  %v1875_v29 = vld [vmem:[%s2556_s1 + $0x78] sm:$0xff] }
0x112d   :  { %1685 = vmatpush.msra.mxu0 %v1875_v29 }
0x112e   :  { %v1615_v1 = vadd.f32 %v1613_v40, %v1612_v0  ;;  %v1666_v40 = vperm.slane %v2355_v4, 4 }
0x112f   :  { %1686 = vmatpush.msra.mxu0 %v1873_v62 }
0x1130   :  { %v1619_v2 = vsel %vm45_vm0, %v1615_v1, 0.0 }
0x1131   :  { %1620 = vadd.xlane.f32.xlu1 %v1619_v2  ;;  %1687 = vmatpush.msra.mxu0 %v1871_v63 }
0x1133   :  { %1688 = vmatpush.msra.mxu0 %v1869_v24 }
0x114d   :  { %v1618_v52 = vpop.xlane.xlu0 %1617 }
0x114e   :  { %v1622_v54 = vmul.f32 %v1618_v52, %v2244_v30 }
0x1150   :  { %v1624_v59 = vsub.f32 %v1614_v42, %v1622_v54 }
0x1152   :  { %v1626_v55 = vmul.f32 %v1624_v59, %v1624_v59 }
0x1154   :  { %v1628_v56 = vsel %vm45_vm0, %v1626_v55, 0.0 }
0x1155   :  { %1629 = vadd.xlane.f32.xlu2 %v1628_v56 }
0x11a4   :  { %v1621_v57 = vpop.xlane.xlu1 %1620 }
0x11a5   :  { %v1623_v53 = vmul.f32 %v1621_v57, %v2244_v30 }
0x11a7   :  { %v1625_v58 = vsub.f32 %v1615_v1, %v1623_v53 }
0x11a9   :  { %v1627_v60 = vmul.f32 %v1625_v58, %v1625_v58 }
0x11ab   :  { %v1631_v61 = vsel %vm45_vm0, %v1627_v60, 0.0 }
0x11ac   :  { %1632 = vadd.xlane.f32.xlu0 %v1631_v61 }
0x11c8   :  { %v1630_v6 = vpop.xlane.xlu2 %1629 }
0x11c9   :  { %v1634_v7 = vmul.f32 %v1630_v6, %v2244_v30 }
0x11cb   :  { %v1636_v9 = vadd.f32 1e-05, %v1634_v7 }
0x11cd   :  { %2023 = vrsqrt.f32 %v1636_v9  ;;  %vm1644_vm2 = vweird.f32 %v1636_v9 }
0x11d3   :  { %v2024_v11 = vpop.eup %2023 }
0x11d4   :  { %v1639_v13 = vmul.f32 %v2024_v11, %v1636_v9  ;;  %vm1645_vm1 = vweird.f32 %v2024_v11 }
0x11d5   :  { %vm1646_vm3 = vmor %vm1644_vm2, %vm1645_vm1 }
0x11d6   :  { %v1640_v14 = vmul.f32 %v2024_v11, %v1639_v13 }
0x11d8   :  { %v1641_v15 = vmul.f32 0.5, %v1640_v14 }
0x11da   :  { %v1642_v17 = vsub.f32 1.5, %v1641_v15 }
0x11dc   :  { %v1643_v48 = vmul.f32 %v2024_v11, %v1642_v17 }
0x11de   :  { %v1647_v19 = vsel %vm1646_vm3, %v2024_v11, %v1643_v48 }
0x11df   :  { %v1658_v20 = vmul.f32 %v1647_v19, %v1624_v59 }
0x11e1   :  { %v1661_v21 = vmul.f32 %v1660_v18, %v1658_v20 }
0x11e3   :  { %v1664_v8 = vadd.f32 %v1663_v12, %v1661_v21 }
0x11e5   :  { %1919 = vmatmul.msk.f32.vlgmr.msra.gmra.mxu0 %vm45_vm0, %v1664_v8 }
0x121f   :  { %v1633_v23 = vpop.xlane.xlu0 %1632 }
0x1220   :  { %v1635_v49 = vmul.f32 %v1633_v23, %v2244_v30 }
0x1222   :  { %v1637_v22 = vadd.f32 1e-05, %v1635_v49 }
0x1224   :  { %2025 = vrsqrt.f32 %v1637_v22  ;;  %vm1654_vm5 = vweird.f32 %v1637_v22 }
0x122a   :  { %v2026_v16 = vpop.eup %2025 }
0x122b   :  { %v1649_v26 = vmul.f32 %v2026_v16, %v1637_v22  ;;  %vm1655_vm4 = vweird.f32 %v2026_v16  ;;  %v2046_v22 = vmov 8.0  }
0x122c   :  { %vm1656_vm7 = vmor %vm1654_vm5, %vm1655_vm4 }
0x122d   :  { %v1650_v27 = vmul.f32 %v2026_v16, %v1649_v26 }
0x122f   :  { %v1651_v28 = vmul.f32 0.5, %v1650_v27  ;;  %v11_v27 = vstv %s2561_s5 }
0x1230   :  { %12 = vst [vmem:[#allocation2] sm:$0x1] %v11_v27 }
0x1231   :  { %v1652_v5 = vsub.f32 1.5, %v1651_v28 }
0x1233   :  { %v1653_v31 = vmul.f32 %v2026_v16, %v1652_v5 }
0x1235   :  { %v1657_v32 = vsel %vm1656_vm7, %v2026_v16, %v1653_v31 }
0x1236   :  { %v1659_v33 = vmul.f32 %v1657_v32, %v1625_v58 }
0x1238   :  { %v1662_v35 = vmul.f32 %v1660_v18, %v1659_v33 }
0x123a   :  { %v1665_v36 = vadd.f32 %v1663_v12, %v1662_v35  ;;  %v1774_v12 = vperm.slane %v2355_v4, 6 }
0x123c   :  { %1920 = vmatmul.msk.f32.gmra.mxu0 %vm45_vm0, %v1665_v36 }
0x1262   :  { %v1690_v41 = vpop.f32.mrf.mxu0 }
0x1263   :  { %v1691_v42 = vadd.f32 %v1690_v41, %v1666_v40 }
0x1265   :  { %v1696_v43 = vmax.f32 %v1691_v42, 0.0 }
0x1267   :  { %1921 = vmatmul.msk.f32.vlgmr.msra.gmra.mxu3 %vm825_vm6, %v1696_v43 }
0x12b9   :  { %v1693_v44 = vpop.f32.mrf.mxu0 }
0x12ba   :  { %v1694_v10 = vadd.f32 %v1693_v44, %v1666_v40 }
0x12bc   :  { %v1697_v50 = vmax.f32 %v1694_v10, 0.0 }
0x12be   :  { %1922 = vmatmul.msk.f32.gmra.mxu3 %vm825_vm6, %v1697_v50 }
0x12ea   :  { %v1722_v51 = vpop.f32.mrf.mxu3 }
0x12eb   :  { %v1723_v0 = vadd.f32 %v1722_v51, %v1698_v3 }
0x12ed   :  { %v1728_v1 = vadd.f32 %v1723_v0, %v1664_v8 }
0x12ef   :  { %v1730_v2 = vsel %vm45_vm0, %v1728_v1, 0.0 }
0x12f0   :  { %1731 = vadd.xlane.f32.xlu2 %v1730_v2 }
0x1341   :  { %v1725_v52 = vpop.f32.mrf.mxu3 }
0x1342   :  { %v1726_v54 = vadd.f32 %v1725_v52, %v1698_v3 }
0x1344   :  { %v1729_v59 = vadd.f32 %v1726_v54, %v1665_v36 }
0x1346   :  { %v1733_v55 = vsel %vm45_vm0, %v1729_v59, 0.0 }
0x1347   :  { %1734 = vadd.xlane.f32.xlu1 %v1733_v55 }
0x1363   :  { %v1732_v56 = vpop.xlane.xlu2 %1731 }
0x1364   :  { %v1736_v57 = vmul.f32 %v1732_v56, %v2244_v30 }
0x1366   :  { %v1738_v53 = vsub.f32 %v1728_v1, %v1736_v57 }
0x1368   :  { %v1740_v58 = vmul.f32 %v1738_v53, %v1738_v53 }
0x136a   :  { %v1742_v60 = vsel %vm45_vm0, %v1740_v58, 0.0 }
0x136b   :  { %1743 = vadd.xlane.f32.xlu1 %v1742_v60  ;;  %v1948_v60 = vld [vmem:[#allocation2] ss:$0 sm:$0xff] }
0x13ba   :  { %v1735_v61 = vpop.xlane.xlu1 %1734 }
0x13bb   :  { %v1737_v29 = vmul.f32 %v1735_v61, %v2244_v30 }
0x13bd   :  { %v1739_v62 = vsub.f32 %v1729_v59, %v1737_v29  ;;  %v1947_v59 = vld [vmem:[%s2560_s4] ss:$0 sm:$0xff] }
0x13bf   :  { %v1741_v63 = vmul.f32 %v1739_v62, %v1739_v62 }
0x13c1   :  { %v1745_v24 = vsel %vm45_vm0, %v1741_v63, 0.0 }
0x13c2   :  { %1746 = vadd.xlane.f32.xlu0 %v1745_v24 }
0x13de   :  { %v1744_v6 = vpop.xlane.xlu1 %1743 }
0x13df   :  { %v1748_v7 = vmul.f32 %v1744_v6, %v2244_v30 }
0x13e1   :  { %v1750_v9 = vadd.f32 1e-05, %v1748_v7 }
0x13e3   :  { %2027 = vrsqrt.f32 %v1750_v9  ;;  %vm1758_vm8 = vweird.f32 %v1750_v9 }
0x13e9   :  { %v2028_v11 = vpop.eup %2027 }
0x13ea   :  { %v1753_v13 = vmul.f32 %v2028_v11, %v1750_v9  ;;  %vm1759_vm6 = vweird.f32 %v2028_v11 }
0x13eb   :  { %vm1760_vm9 = vmor %vm1758_vm8, %vm1759_vm6 }
0x13ec   :  { %v1754_v14 = vmul.f32 %v2028_v11, %v1753_v13 }
0x13ee   :  { %v1755_v15 = vmul.f32 0.5, %v1754_v14 }
0x13f0   :  { %v1756_v17 = vsub.f32 1.5, %v1755_v15 }
0x13f2   :  { %v1757_v48 = vmul.f32 %v2028_v11, %v1756_v17 }
0x13f4   :  { %v1761_v18 = vsel %vm1760_vm9, %v2028_v11, %v1757_v48 }
0x13f5   :  { %v1772_v21 = vmul.f32 %v1761_v18, %v1738_v53 }
0x13f7   :  { %v1775_v46 = vmul.f32 %v1774_v12, %v1772_v21 }
0x13f9   :  { %v1778_v23 = vadd.f32 %v1777_v45, %v1775_v46 }
0x13fb   :  { %v1780_v34 = vsel %vm45_vm0, %v1778_v23, 0.0 }
0x1435   :  { %v1747_v19 = vpop.xlane.xlu0 %1746 }
0x1436   :  { %v1749_v20 = vmul.f32 %v1747_v19, %v2244_v30  ;;  %v1781_v30 = vrot.slane %v1780_v34, 4 }
0x1438   :  { %v1751_v8 = vadd.f32 1e-05, %v1749_v20  ;;  %v1782_v31 = vadd.f32 %v1781_v30, %v1780_v34 }
0x143a   :  { %2029 = vrsqrt.f32 %v1751_v8  ;;  %vm1768_vm11 = vweird.f32 %v1751_v8  ;;  %v1783_v36 = vrot.slane %v1782_v31, 2 }
0x143b   :  { %2031 = vrcp.f32 %v2046_v22 }
0x143c   :  { %v1784_v40 = vadd.f32 %v1783_v36, %v1782_v31 }
0x143e   :  { %v1785_v44 = vrot.slane %v1784_v40, 1 }
0x1440   :  { %v2030_v47 = vpop.eup %2029  ;;  %v1786_v51 = vadd.f32 %v1785_v44, %v1784_v40 }
0x1441   :  { %v1763_v49 = vmul.f32 %v2030_v47, %v1751_v8  ;;  %vm1769_vm10 = vweird.f32 %v2030_v47  ;;  %v2032_v28 = vpop.eup %2031 }
0x1442   :  { %vm1770_vm12 = vmor %vm1768_vm11, %vm1769_vm10  ;;  %v1795_v33 = vmul.f32 8.0, %v2032_v28  ;;  %vm1799_vm13 = vweird.f32 %v2032_v28 }
0x1443   :  { %v1764_v25 = vmul.f32 %v2030_v47, %v1763_v49 }
0x1444   :  { %v1796_v38 = vsub.f32 1.0, %v1795_v33 }
0x1445   :  { %v1765_v16 = vmul.f32 0.5, %v1764_v25 }
0x1446   :  { %v1797_v42 = vmul.f32 %v2032_v28, %v1796_v38 }
0x1447   :  { %v1766_v26 = vsub.f32 1.5, %v1765_v16 }
0x1448   :  { %v1798_v50 = vadd.f32 %v2032_v28, %v1797_v42 }
0x1449   :  { %v1767_v4 = vmul.f32 %v2030_v47, %v1766_v26 }
0x144a   :  { %v1800_v1 = vsel %vm1799_vm13, %v2032_v28, %v1798_v50 }
0x144b   :  { %v1771_v5 = vsel %vm1770_vm12, %v2030_v47, %v1767_v4  ;;  %v1801_v52 = vmul.f32 %v1800_v1, %v1786_v51 }
0x144c   :  { %v1773_v32 = vmul.f32 %v1771_v5, %v1739_v62 }
0x144d   :  { %v1807_v56 = vmul.f32 %v1947_v59, %v1801_v52 }
0x144e   :  { %v1776_v35 = vmul.f32 %v1774_v12, %v1773_v32 }
0x1450   :  { %v1779_v37 = vadd.f32 %v1777_v45, %v1776_v35 }
0x1452   :  { %v1787_v39 = vsel %vm45_vm0, %v1779_v37, 0.0  ;;  %vm1812_vm0 = vcmask 1041409  }
0x1453   :  { %v1788_v41 = vrot.slane %v1787_v39, 4 }
0x1455   :  { %v1789_v43 = vadd.f32 %v1788_v41, %v1787_v39 }
0x1457   :  { %v1790_v10 = vrot.slane %v1789_v43, 2 }
0x1459   :  { %v1791_v3 = vadd.f32 %v1790_v10, %v1789_v43 }
0x145b   :  { %v1792_v0 = vrot.slane %v1791_v3, 1 }
0x145d   :  { %v1793_v2 = vadd.f32 %v1792_v0, %v1791_v3 }
0x145f   :  { %v1802_v54 = vmul.f32 %v1800_v1, %v1793_v2 }
0x1461   :  { %v1808_v55 = vmul.f32 %v1947_v59, %v1802_v54 }
0x1463   :  { %v1811_v57 = vrot.slane %v1808_v55, 7 }
0x1465   :  { %v1813_v53 = vsel %vm1812_vm0, %v1811_v57, %v1807_v56 }
0x1466   :  { %v1816_v58 = vsel %vm1815_vm14, %v1813_v53, 0.0 }
0x1467   :  { %1817 = vadd.xlane.f32.xlu2 %v1816_v58 }
0x14da   :  { %v1818_v61 = vpop.xlane.xlu2 %1817 }
0x14db   :  { %v1823_v29 = vadd.f32 %v1948_v60, %v1818_v61 }
0x14dd   :  { %1825 = vst.msk [vmem:[%s2562_s6] sm:$0x3] %vm1824_vm15, %v1823_v29 }

</bundles_post_ra>
